<compile_context>
chip_gen: v7x
topology: tpu7x:2x2x1
jax: 0.10.0
libtpu: 0.0.40
codegen_flags: <defaults>
</compile_context>

<pallas_src>
import functools
import math

import jax
import jax.numpy as jnp
from jax.experimental import pallas as pl
from jax.experimental.pallas import tpu as pltpu


# ----------------------------------------------------------------------------
# in-kernel math helpers
# ----------------------------------------------------------------------------
def _layernorm(v, eps=1e-6):
    mu = jnp.mean(v, axis=-1, keepdims=True)
    var = jnp.mean((v - mu) ** 2, axis=-1, keepdims=True)
    return (v - mu) * jax.lax.rsqrt(var + eps)


def _silu(v):
    # sigmoid via EUP exp + approx reciprocal (frees VALU slots)
    return v * pl.reciprocal(1.0 + jnp.exp(-v), approx=True)


def _gelu_tanh(v):
    # GELU(approximate='tanh')
    return 0.5 * v * (1.0 + jnp.tanh(0.7978845608028654 * (v + 0.044715 * v * v * v)))


# ----------------------------------------------------------------------------
# Pallas kernels
# ----------------------------------------------------------------------------
def dit_block_kernel(x_ref, c_ref,
                     w_ada_ref, b_ada_ref,
                     w_qkv_ref, b_qkv_ref,
                     w_proj_ref, b_proj_ref,
                     w_fc1_ref, b_fc1_ref,
                     w_fc2_ref, b_fc2_ref,
                     o_ref, *, batch, tokens_per_batch, num_heads):
    """One DiT block (adaLN-Zero attention + MLP) for the whole batch."""
    B, N = batch, tokens_per_batch
    x = x_ref[...]                     # (B*N, H)  f32
    c = c_ref[...]                     # (B, H)    f32
    H = x.shape[-1]
    hd = H // num_heads
    qk_scale = 1.0 / math.sqrt(hd)
    bf16 = jnp.bfloat16

    # ---- fused adaLN: SiLU(c) @ (H, 6H) -> 6 chunks ----
    sc = _silu(c)
    ada = (jnp.dot(sc.astype(bf16), w_ada_ref[...],
                   preferred_element_type=jnp.float32) + b_ada_ref[...])     # (B, 6H)
    # broadcast each batch row to its N tokens -> (B*N, 6H)
    ada_tok = jnp.concatenate(
        [jnp.broadcast_to(ada[b:b + 1, :], (N, 6 * H)) for b in range(B)], axis=0)
    shift_msa = ada_tok[:, 0 * H:1 * H]
    scale_msa = ada_tok[:, 1 * H:2 * H]
    gate_msa = ada_tok[:, 2 * H:3 * H]
    shift_mlp = ada_tok[:, 3 * H:4 * H]
    scale_mlp = ada_tok[:, 4 * H:5 * H]
    gate_mlp = ada_tok[:, 5 * H:6 * H]

    # ---------------- attention branch ----------------
    xm = _layernorm(x) * (1.0 + scale_msa) + shift_msa                        # (B*N, H)
    qkv = (jnp.dot(xm.astype(bf16), w_qkv_ref[...],
                   preferred_element_type=jnp.float32) + b_qkv_ref[...])      # (B*N, 3H)
    q = qkv[:, 0:H] * qk_scale
    k = qkv[:, H:2 * H]
    v = qkv[:, 2 * H:3 * H]

    per_batch = []
    for b in range(B):
        r0, r1 = b * N, (b + 1) * N
        per_head = []
        for h in range(num_heads):
            c0, c1 = h * hd, (h + 1) * hd
            qh = q[r0:r1, c0:c1]
            kh = k[r0:r1, c0:c1]
            vh = v[r0:r1, c0:c1]
            # scores = qh @ kh^T (contraction on head_dim, no explicit transpose)
            s = jax.lax.dot_general(qh, kh, (((1,), (1,)), ((), ())),
                                    preferred_element_type=jnp.float32)       # (N, N)
            s = s - jnp.max(s, axis=-1, keepdims=True)
            p = jnp.exp(s)
            p = p * pl.reciprocal(jnp.sum(p, axis=-1, keepdims=True), approx=True)
            per_head.append(jnp.dot(p, vh, preferred_element_type=jnp.float32))
        per_batch.append(jnp.concatenate(per_head, axis=-1))                  # (N, H)
    attn = jnp.concatenate(per_batch, axis=0)                                 # (B*N, H)
    # single fused output projection
    attn = (jnp.dot(attn.astype(bf16), w_proj_ref[...],
                    preferred_element_type=jnp.float32) + b_proj_ref[...])
    x = x + gate_msa * attn

    # ---------------- MLP branch ----------------
    xm2 = _layernorm(x) * (1.0 + scale_mlp) + shift_mlp
    h1 = (jnp.dot(xm2.astype(bf16), w_fc1_ref[...],
                  preferred_element_type=jnp.float32) + b_fc1_ref[...])
    h1 = _gelu_tanh(h1)
    h2 = (jnp.dot(h1.astype(bf16), w_fc2_ref[...],
                  preferred_element_type=jnp.float32) + b_fc2_ref[...])
    x = x + gate_mlp * h2

    o_ref[...] = x


def final_layer_kernel(x_ref, c_ref, w_ada_ref, b_ada_ref, w_lin_ref, b_lin_ref,
                       o_ref, *, batch, tokens_per_batch):
    """FinalLayer: fused adaLN modulation of LayerNorm(x) + linear projection."""
    B, N = batch, tokens_per_batch
    x = x_ref[...]                     # (B*N, H)
    c = c_ref[...]                     # (B, H)
    H = x.shape[-1]
    bf16 = jnp.bfloat16

    sc = _silu(c)
    ada = (jnp.dot(sc.astype(bf16), w_ada_ref[...],
                   preferred_element_type=jnp.float32) + b_ada_ref[...])      # (B, 2H)
    ada_tok = jnp.concatenate(
        [jnp.broadcast_to(ada[b:b + 1, :], (N, 2 * H)) for b in range(B)], axis=0)
    shift = ada_tok[:, 0:H]
    scale = ada_tok[:, H:2 * H]

    xm = _layernorm(x) * (1.0 + scale) + shift
    o_ref[...] = (jnp.dot(xm.astype(bf16), w_lin_ref[...],
                          preferred_element_type=jnp.float32) + b_lin_ref[...])


# ----------------------------------------------------------------------------
# pallas_call wrappers (single grid step: everything resident in VMEM)
# ----------------------------------------------------------------------------
_COMPILER_PARAMS = pltpu.CompilerParams(vmem_limit_bytes=32 * 1024 * 1024)
# TODO(synk): at real DiT sizes (H ~ 1152) the fully-resident weight pattern must be
# replaced by a tiled contraction grid axis with a VMEM accumulator (v7x 64 MiB VMEM).


def run_dit_block(x2d, c, blk, *, batch, tokens, num_heads):
    """x2d: (B*N, H) f32, c: (B, H) f32."""
    BN, H = x2d.shape
    kernel = functools.partial(dit_block_kernel, batch=batch,
                               tokens_per_batch=tokens, num_heads=num_heads)
    weight_args = (blk["w_ada"], blk["b_ada"], blk["w_qkv"], blk["b_qkv"],
                   blk["w_proj"], blk["b_proj"], blk["w_fc1"], blk["b_fc1"],
                   blk["w_fc2"], blk["b_fc2"])
    return pl.pallas_call(
        kernel,
        out_shape=jax.ShapeDtypeStruct((BN, H), jnp.float32),
        input_output_aliases={0: 0},          # residual stream updated in place
        compiler_params=_COMPILER_PARAMS,
    )(x2d, c, *weight_args)


def run_final_layer(x2d, c, fin, *, batch, tokens):
    BN, H = x2d.shape
    out_dim = fin["w_lin"].shape[-1]
    kernel = functools.partial(final_layer_kernel, batch=batch, tokens_per_batch=tokens)
    weight_args = (fin["w_ada"], fin["b_ada"], fin["w_lin"], fin["b_lin"])
    return pl.pallas_call(
        kernel,
        out_shape=jax.ShapeDtypeStruct((BN, out_dim), jnp.float32),
        compiler_params=_COMPILER_PARAMS,
    )(x2d, c, *weight_args)


# ----------------------------------------------------------------------------
# plain-JAX glue (embeddings)
# ----------------------------------------------------------------------------
def pos_embedding_coords_sine(xyz, d_model, n_dim, temperature=10000.0):
    """PositionEmbeddingCoordsSine.forward  (xyz: (..., n_dim))."""
    num_pos_feats = d_model // n_dim // 2 * 2
    padding = d_model - num_pos_feats * n_dim
    scale = 1.0 * 2.0 * math.pi
    dim_t = jnp.arange(num_pos_feats, dtype=jnp.float32)
    dim_t = temperature ** (2.0 * jnp.floor(dim_t / 2.0) / num_pos_feats)
    xyz = xyz * scale
    pos_divided = xyz[..., None] / dim_t                        # (..., n_dim, npf)
    pos_sin = jnp.sin(pos_divided[..., 0::2])
    pos_cos = jnp.cos(pos_divided[..., 1::2])
    pos_emb = jnp.stack([pos_sin, pos_cos], axis=-1)            # (..., n_dim, npf//2, 2)
    pos_emb = pos_emb.reshape(*xyz.shape[:-1], -1)              # (..., n_dim*npf)
    pad_cfg = [(0, 0)] * (pos_emb.ndim - 1) + [(0, padding)]
    return jnp.pad(pos_emb, pad_cfg)


def timestep_embedding(t, dim, max_period=10000.0):
    half = dim // 2
    freqs = jnp.exp(-math.log(max_period) * jnp.arange(half, dtype=jnp.float32) / half)
    args = t[:, None].astype(jnp.float32) * freqs[None]
    return jnp.concatenate([jnp.cos(args), jnp.sin(args)], axis=-1)


# ----------------------------------------------------------------------------
# parameter construction (deterministic, synthetic; bf16 matmul weights)
# ----------------------------------------------------------------------------
def init_params(key, *, hidden, num_heads, mlp_ratio, depth, in_channels,
                patch_sq, out_channels, num_classes, freq_size=256):
    mlp_hidden = int(hidden * mlp_ratio)
    bf = jnp.bfloat16

    def nrm(k, shape, std=0.05, dtype=jnp.float32):
        return (std * jax.random.normal(k, shape, dtype=jnp.float32)).astype(dtype)

    keys = iter(jax.random.split(key, 16 + depth * 12))
    p = {}
    # PatchEmbed: Linear(in_channels * patch_sq -> hidden)
    p["x_w"] = nrm(next(keys), (in_channels * patch_sq, hidden))
    p["x_b"] = jnp.zeros((hidden,), jnp.float32)
    # TimestepEmbedder MLP
    p["t_w1"] = nrm(next(keys), (freq_size, hidden))
    p["t_b1"] = jnp.zeros((hidden,), jnp.float32)
    p["t_w2"] = nrm(next(keys), (hidden, hidden))
    p["t_b2"] = jnp.zeros((hidden,), jnp.float32)
    # LabelEmbedder (num_classes + 1 rows: CFG null token since dropout_prob > 0)
    p["y_table"] = nrm(next(keys), (num_classes + 1, hidden), std=0.02)

    blocks = []
    for _ in range(depth):
        blk = {
            # fused layouts: adaLN (H, 6H), QKV (H, 3H) laid out [q|k|v] with
            # contiguous per-head columns, out-proj (H, H), MLP (H, Hm)/(Hm, H)
            "w_ada": nrm(next(keys), (hidden, 6 * hidden), dtype=bf),
            "b_ada": nrm(next(keys), (1, 6 * hidden), std=0.02),
            "w_qkv": nrm(next(keys), (hidden, 3 * hidden), dtype=bf),
            "b_qkv": nrm(next(keys), (1, 3 * hidden), std=0.02),
            "w_proj": nrm(next(keys), (hidden, hidden), dtype=bf),
            "b_proj": nrm(next(keys), (1, hidden), std=0.02),
            "w_fc1": nrm(next(keys), (hidden, mlp_hidden), dtype=bf),
            "b_fc1": nrm(next(keys), (1, mlp_hidden), std=0.02),
            "w_fc2": nrm(next(keys), (mlp_hidden, hidden), dtype=bf),
            "b_fc2": nrm(next(keys), (1, hidden), std=0.02),
        }
        blocks.append(blk)
    p["blocks"] = blocks

    p["final"] = {
        "w_ada": nrm(next(keys), (hidden, 2 * hidden), dtype=bf),
        "b_ada": nrm(next(keys), (1, 2 * hidden), std=0.02),
        "w_lin": nrm(next(keys), (hidden, patch_sq * out_channels), dtype=bf),
        "b_lin": nrm(next(keys), (1, patch_sq * out_channels), std=0.02),
    }
    return p


# ----------------------------------------------------------------------------
# full DiT forward (eval mode: no label dropout)
# ----------------------------------------------------------------------------
def dit_forward(params, x, t, y, *, hidden, num_heads, patch_sq, out_channels,
                in_channels, freq_size=256):
    B, N_C, N_P, D = x.shape
    assert N_P == patch_sq and D == in_channels

    # patch embedding + sinusoidal position embedding of per-patch mean coords
    x_p_avg = jnp.mean(x, axis=2)                                  # (B, N, in_ch)
    x_tok = x.reshape(B, N_C, N_P * D)
    h = x_tok @ params["x_w"] + params["x_b"]                      # (B, N, H)
    h = h + pos_embedding_coords_sine(x_p_avg, hidden, in_channels)

    # conditioning vector c = t_emb + y_emb
    t_freq = timestep_embedding(t, freq_size)                      # (B, 256)
    t_emb = t_freq @ params["t_w1"] + params["t_b1"]
    t_emb = t_emb * jax.nn.sigmoid(t_emb)                          # SiLU
    t_emb = t_emb @ params["t_w2"] + params["t_b2"]                # (B, H)
    y_emb = params["y_table"][y]                                   # (B, H)
    # TODO(synk): training-mode label dropout (token_drop RNG) not implemented; eval path only.
    c = t_emb + y_emb                                              # (B, H)

    # transformer blocks (Pallas kernels) on the flattened token matrix
    h2d = h.reshape(B * N_C, hidden)
    for blk in params["blocks"]:
        h2d = run_dit_block(h2d, c, blk, batch=B, tokens=N_C, num_heads=num_heads)

    # final layer (Pallas kernel) + unpatchify
    out = run_final_layer(h2d, c, params["final"], batch=B, tokens=N_C)
    return out.reshape(B, N_C, patch_sq, out_channels)


# ----------------------------------------------------------------------------
# main
# ----------------------------------------------------------------------------
if __name__ == "__main__":
    # small config consistent with DiT(input_size=16, patch_size=3, in_channels=3,
    #                                   hidden_size=32, depth=2, num_heads=4)
    B = 2
    N_PATCHES = 16          # input_size (number of folded patches)
    PATCH = 3
    PATCH_SQ = PATCH ** 2   # 9 pixels per folded patch
    IN_CH = 3
    HIDDEN = 32
    NUM_HEADS = 4
    DEPTH = 2
    MLP_RATIO = 4.0
    NUM_CLASSES = 10
    OUT_CH = IN_CH          # learn_sigma = False

    key = jax.random.PRNGKey(0)
    k_p, k_x, k_t = jax.random.split(key, 3)

    params = init_params(
        k_p, hidden=HIDDEN, num_heads=NUM_HEADS, mlp_ratio=MLP_RATIO, depth=DEPTH,
        in_channels=IN_CH, patch_sq=PATCH_SQ, out_channels=OUT_CH,
        num_classes=NUM_CLASSES)

    x = jax.random.normal(k_x, (B, N_PATCHES, PATCH_SQ, IN_CH), dtype=jnp.float32)
    t = jnp.array([10.0, 250.0], dtype=jnp.float32)
    y = jnp.array([1, 7], dtype=jnp.int32)

    forward = jax.jit(functools.partial(
        dit_forward, hidden=HIDDEN, num_heads=NUM_HEADS, patch_sq=PATCH_SQ,
        out_channels=OUT_CH, in_channels=IN_CH))

    out = forward(params, x, t, y)
    out = jax.block_until_ready(out)

    assert out.shape == (B, N_PATCHES, PATCH_SQ, OUT_CH), out.shape
    assert bool(jnp.all(jnp.isfinite(out)))
    print("KERNEL_OK")
</pallas_src>

<mosaic_0001>
module attributes {stable_mosaic.version = 11 : i64} {
  func.func @final_layer_kernel(%arg0: memref<32x32xf32, #tpu.memory_space<vmem>>, %arg1: memref<2x32xf32, #tpu.memory_space<vmem>>, %arg2: memref<32x64xbf16, #tpu.memory_space<vmem>>, %arg3: memref<1x64xf32, #tpu.memory_space<vmem>>, %arg4: memref<32x27xbf16, #tpu.memory_space<vmem>>, %arg5: memref<1x27xf32, #tpu.memory_space<vmem>>, %arg6: memref<32x27xf32, #tpu.memory_space<vmem>>) attributes {dimension_semantics = [], scalar_prefetch = 0 : i64, scratch_operands = 0 : i64, tpu.core_type = #tpu.core_type<tc>} {
    %c0 = arith.constant 0 : index
    %c0_0 = arith.constant 0 : index
    %0 = vector.load %arg0[%c0, %c0_0] : memref<32x32xf32, #tpu.memory_space<vmem>>, vector<32x32xf32>
    %c0_1 = arith.constant 0 : index
    %c0_2 = arith.constant 0 : index
    %1 = vector.load %arg1[%c0_1, %c0_2] : memref<2x32xf32, #tpu.memory_space<vmem>>, vector<2x32xf32>
    %cst = arith.constant 0.000000e+00 : f32
    %2 = vector.broadcast %cst : f32 to vector<2x32xf32>
    %3 = arith.subf %2, %1 : vector<2x32xf32>
    %4 = math.exp %3 : vector<2x32xf32>
    %cst_3 = arith.constant 1.000000e+00 : f32
    %5 = vector.broadcast %cst_3 : f32 to vector<2x32xf32>
    %6 = arith.addf %5, %4 : vector<2x32xf32>
    %7 = tpu.reciprocal %6 {approx = true} : vector<2x32xf32> -> vector<2x32xf32>
    %8 = arith.mulf %1, %7 : vector<2x32xf32>
    %9 = arith.truncf %8 : vector<2x32xf32> to vector<2x32xbf16>
    %c0_4 = arith.constant 0 : index
    %c0_5 = arith.constant 0 : index
    %10 = vector.load %arg2[%c0_4, %c0_5] : memref<32x64xbf16, #tpu.memory_space<vmem>>, vector<32x64xbf16>
    %cst_6 = arith.constant dense<0.000000e+00> : vector<2x64xf32>
    %11 = tpu.matmul %9, %10, %cst_6 {dimension_numbers = #tpu.dot_dimension_numbers<[1], [0], [0], [1], [0, 0, 1, 1], [], []>} : vector<2x32xbf16>, vector<32x64xbf16>, vector<2x64xf32> -> vector<2x64xf32>
    %c0_7 = arith.constant 0 : index
    %c0_8 = arith.constant 0 : index
    %12 = vector.load %arg3[%c0_7, %c0_8] : memref<1x64xf32, #tpu.memory_space<vmem>>, vector<1x64xf32>
    %13 = vector.broadcast %12 : vector<1x64xf32> to vector<2x64xf32>
    %14 = arith.addf %11, %13 : vector<2x64xf32>
    %15 = vector.extract_strided_slice %14 {offsets = [0, 0], sizes = [1, 64], strides = [1, 1]} : vector<2x64xf32> to vector<1x64xf32>
    %16 = vector.shape_cast %15 : vector<1x64xf32> to vector<1x64xf32>
    %17 = vector.broadcast %16 : vector<1x64xf32> to vector<16x64xf32>
    %18 = vector.extract_strided_slice %14 {offsets = [1, 0], sizes = [1, 64], strides = [1, 1]} : vector<2x64xf32> to vector<1x64xf32>
    %19 = vector.shape_cast %18 : vector<1x64xf32> to vector<1x64xf32>
    %20 = vector.broadcast %19 : vector<1x64xf32> to vector<16x64xf32>
    %21 = tpu.concatenate %17, %20 in 0 : vector<16x64xf32>, vector<16x64xf32> -> vector<32x64xf32>
    %22 = vector.extract_strided_slice %21 {offsets = [0, 0], sizes = [32, 32], strides = [1, 1]} : vector<32x64xf32> to vector<32x32xf32>
    %23 = vector.extract_strided_slice %21 {offsets = [0, 32], sizes = [32, 32], strides = [1, 1]} : vector<32x64xf32> to vector<32x32xf32>
    %cst_9 = arith.constant dense<0.000000e+00> : vector<32xf32>
    %24 = vector.multi_reduction <add>, %0, %cst_9 [1] : vector<32x32xf32> to vector<32xf32>
    %25 = vector.shape_cast %24 : vector<32xf32> to vector<32x1xf32>
    %cst_10 = arith.constant 3.200000e+01 : f32
    %26 = vector.broadcast %cst_10 : f32 to vector<32x1xf32>
    %27 = arith.divf %25, %26 : vector<32x1xf32>
    %28 = vector.broadcast %27 : vector<32x1xf32> to vector<32x32xf32>
    %29 = arith.subf %0, %28 : vector<32x32xf32>
    %30 = arith.mulf %29, %29 : vector<32x32xf32>
    %cst_11 = arith.constant dense<0.000000e+00> : vector<32xf32>
    %31 = vector.multi_reduction <add>, %30, %cst_11 [1] : vector<32x32xf32> to vector<32xf32>
    %32 = vector.shape_cast %31 : vector<32xf32> to vector<32x1xf32>
    %cst_12 = arith.constant 3.200000e+01 : f32
    %33 = vector.broadcast %cst_12 : f32 to vector<32x1xf32>
    %34 = arith.divf %32, %33 : vector<32x1xf32>
    %35 = vector.broadcast %27 : vector<32x1xf32> to vector<32x32xf32>
    %36 = arith.subf %0, %35 : vector<32x32xf32>
    %cst_13 = arith.constant 9.99999997E-7 : f32
    %37 = vector.broadcast %cst_13 : f32 to vector<32x1xf32>
    %38 = arith.addf %34, %37 : vector<32x1xf32>
    %39 = math.rsqrt %38 : vector<32x1xf32>
    %40 = vector.broadcast %39 : vector<32x1xf32> to vector<32x32xf32>
    %41 = arith.mulf %36, %40 : vector<32x32xf32>
    %cst_14 = arith.constant 1.000000e+00 : f32
    %42 = vector.broadcast %cst_14 : f32 to vector<32x32xf32>
    %43 = arith.addf %42, %23 : vector<32x32xf32>
    %44 = arith.mulf %41, %43 : vector<32x32xf32>
    %45 = arith.addf %44, %22 : vector<32x32xf32>
    %46 = arith.truncf %45 : vector<32x32xf32> to vector<32x32xbf16>
    %c0_15 = arith.constant 0 : index
    %c0_16 = arith.constant 0 : index
    %47 = vector.load %arg4[%c0_15, %c0_16] : memref<32x27xbf16, #tpu.memory_space<vmem>>, vector<32x27xbf16>
    %cst_17 = arith.constant dense<0.000000e+00> : vector<32x27xf32>
    %48 = tpu.matmul %46, %47, %cst_17 {dimension_numbers = #tpu.dot_dimension_numbers<[1], [0], [0], [1], [0, 0, 1, 1], [], []>} : vector<32x32xbf16>, vector<32x27xbf16>, vector<32x27xf32> -> vector<32x27xf32>
    %c0_18 = arith.constant 0 : index
    %c0_19 = arith.constant 0 : index
    %49 = vector.load %arg5[%c0_18, %c0_19] : memref<1x27xf32, #tpu.memory_space<vmem>>, vector<1x27xf32>
    %50 = vector.broadcast %49 : vector<1x27xf32> to vector<32x27xf32>
    %51 = arith.addf %48, %50 : vector<32x27xf32>
    %c0_20 = arith.constant 0 : index
    %c0_21 = arith.constant 0 : index
    %52 = vector.load %arg6[%c0_20, %c0_21] : memref<32x27xf32, #tpu.memory_space<vmem>>, vector<32x27xf32>
    tpu.vector_store %arg6[%c0_20, %c0_21], %51 {strides = array<i32>} : memref<32x27xf32, #tpu.memory_space<vmem>>, vector<32x27xf32>,
    return
  }
}

module attributes {stable_mosaic.version = 11 : i64} {
  func.func @dit_block_kernel(%arg0: memref<32x32xf32, #tpu.memory_space<vmem>>, %arg1: memref<2x32xf32, #tpu.memory_space<vmem>>, %arg2: memref<32x192xbf16, #tpu.memory_space<vmem>>, %arg3: memref<1x192xf32, #tpu.memory_space<vmem>>, %arg4: memref<32x96xbf16, #tpu.memory_space<vmem>>, %arg5: memref<1x96xf32, #tpu.memory_space<vmem>>, %arg6: memref<32x32xbf16, #tpu.memory_space<vmem>>, %arg7: memref<1x32xf32, #tpu.memory_space<vmem>>, %arg8: memref<32x128xbf16, #tpu.memory_space<vmem>>, %arg9: memref<1x128xf32, #tpu.memory_space<vmem>>, %arg10: memref<128x32xbf16, #tpu.memory_space<vmem>>, %arg11: memref<1x32xf32, #tpu.memory_space<vmem>>, %arg12: memref<32x32xf32, #tpu.memory_space<vmem>>) attributes {dimension_semantics = [], scalar_prefetch = 0 : i64, scratch_operands = 0 : i64, tpu.core_type = #tpu.core_type<tc>} {
    %c0 = arith.constant 0 : index
    %c0_0 = arith.constant 0 : index
    %0 = vector.load %arg0[%c0, %c0_0] : memref<32x32xf32, #tpu.memory_space<vmem>>, vector<32x32xf32>
    %c0_1 = arith.constant 0 : index
    %c0_2 = arith.constant 0 : index
    %1 = vector.load %arg1[%c0_1, %c0_2] : memref<2x32xf32, #tpu.memory_space<vmem>>, vector<2x32xf32>
    %cst = arith.constant 0.000000e+00 : f32
    %2 = vector.broadcast %cst : f32 to vector<2x32xf32>
    %3 = arith.subf %2, %1 : vector<2x32xf32>
    %4 = math.exp %3 : vector<2x32xf32>
    %cst_3 = arith.constant 1.000000e+00 : f32
    %5 = vector.broadcast %cst_3 : f32 to vector<2x32xf32>
    %6 = arith.addf %5, %4 : vector<2x32xf32>
    %7 = tpu.reciprocal %6 {approx = true} : vector<2x32xf32> -> vector<2x32xf32>
    %8 = arith.mulf %1, %7 : vector<2x32xf32>
    %9 = arith.truncf %8 : vector<2x32xf32> to vector<2x32xbf16>
    %c0_4 = arith.constant 0 : index
    %c0_5 = arith.constant 0 : index
    %10 = vector.load %arg2[%c0_4, %c0_5] : memref<32x192xbf16, #tpu.memory_space<vmem>>, vector<32x192xbf16>
    %cst_6 = arith.constant dense<0.000000e+00> : vector<2x192xf32>
    %11 = tpu.matmul %9, %10, %cst_6 {dimension_numbers = #tpu.dot_dimension_numbers<[1], [0], [0], [1], [0, 0, 1, 1], [], []>} : vector<2x32xbf16>, vector<32x192xbf16>, vector<2x192xf32> -> vector<2x192xf32>
    %c0_7 = arith.constant 0 : index
    %c0_8 = arith.constant 0 : index
    %12 = vector.load %arg3[%c0_7, %c0_8] : memref<1x192xf32, #tpu.memory_space<vmem>>, vector<1x192xf32>
    %13 = vector.broadcast %12 : vector<1x192xf32> to vector<2x192xf32>
    %14 = arith.addf %11, %13 : vector<2x192xf32>
    %15 = vector.extract_strided_slice %14 {offsets = [0, 0], sizes = [1, 192], strides = [1, 1]} : vector<2x192xf32> to vector<1x192xf32>
    %16 = vector.shape_cast %15 : vector<1x192xf32> to vector<1x192xf32>
    %17 = vector.broadcast %16 : vector<1x192xf32> to vector<16x192xf32>
    %18 = vector.extract_strided_slice %14 {offsets = [1, 0], sizes = [1, 192], strides = [1, 1]} : vector<2x192xf32> to vector<1x192xf32>
    %19 = vector.shape_cast %18 : vector<1x192xf32> to vector<1x192xf32>
    %20 = vector.broadcast %19 : vector<1x192xf32> to vector<16x192xf32>
    %21 = tpu.concatenate %17, %20 in 0 : vector<16x192xf32>, vector<16x192xf32> -> vector<32x192xf32>
    %22 = vector.extract_strided_slice %21 {offsets = [0, 0], sizes = [32, 32], strides = [1, 1]} : vector<32x192xf32> to vector<32x32xf32>
    %23 = vector.extract_strided_slice %21 {offsets = [0, 32], sizes = [32, 32], strides = [1, 1]} : vector<32x192xf32> to vector<32x32xf32>
    %24 = vector.extract_strided_slice %21 {offsets = [0, 64], sizes = [32, 32], strides = [1, 1]} : vector<32x192xf32> to vector<32x32xf32>
    %25 = vector.extract_strided_slice %21 {offsets = [0, 96], sizes = [32, 32], strides = [1, 1]} : vector<32x192xf32> to vector<32x32xf32>
    %26 = vector.extract_strided_slice %21 {offsets = [0, 128], sizes = [32, 32], strides = [1, 1]} : vector<32x192xf32> to vector<32x32xf32>
    %27 = vector.extract_strided_slice %21 {offsets = [0, 160], sizes = [32, 32], strides = [1, 1]} : vector<32x192xf32> to vector<32x32xf32>
    %cst_9 = arith.constant dense<0.000000e+00> : vector<32xf32>
    %28 = vector.multi_reduction <add>, %0, %cst_9 [1] : vector<32x32xf32> to vector<32xf32>
    %29 = vector.shape_cast %28 : vector<32xf32> to vector<32x1xf32>
    %cst_10 = arith.constant 3.200000e+01 : f32
    %30 = vector.broadcast %cst_10 : f32 to vector<32x1xf32>
    %31 = arith.divf %29, %30 : vector<32x1xf32>
    %32 = vector.broadcast %31 : vector<32x1xf32> to vector<32x32xf32>
    %33 = arith.subf %0, %32 : vector<32x32xf32>
    %34 = arith.mulf %33, %33 : vector<32x32xf32>
    %cst_11 = arith.constant dense<0.000000e+00> : vector<32xf32>
    %35 = vector.multi_reduction <add>, %34, %cst_11 [1] : vector<32x32xf32> to vector<32xf32>
    %36 = vector.shape_cast %35 : vector<32xf32> to vector<32x1xf32>
    %cst_12 = arith.constant 3.200000e+01 : f32
    %37 = vector.broadcast %cst_12 : f32 to vector<32x1xf32>
    %38 = arith.divf %36, %37 : vector<32x1xf32>
    %39 = vector.broadcast %31 : vector<32x1xf32> to vector<32x32xf32>
    %40 = arith.subf %0, %39 : vector<32x32xf32>
    %cst_13 = arith.constant 9.99999997E-7 : f32
    %41 = vector.broadcast %cst_13 : f32 to vector<32x1xf32>
    %42 = arith.addf %38, %41 : vector<32x1xf32>
    %43 = math.rsqrt %42 : vector<32x1xf32>
    %44 = vector.broadcast %43 : vector<32x1xf32> to vector<32x32xf32>
    %45 = arith.mulf %40, %44 : vector<32x32xf32>
    %cst_14 = arith.constant 1.000000e+00 : f32
    %46 = vector.broadcast %cst_14 : f32 to vector<32x32xf32>
    %47 = arith.addf %46, %23 : vector<32x32xf32>
    %48 = arith.mulf %45, %47 : vector<32x32xf32>
    %49 = arith.addf %48, %22 : vector<32x32xf32>
    %50 = arith.truncf %49 : vector<32x32xf32> to vector<32x32xbf16>
    %c0_15 = arith.constant 0 : index
    %c0_16 = arith.constant 0 : index
    %51 = vector.load %arg4[%c0_15, %c0_16] : memref<32x96xbf16, #tpu.memory_space<vmem>>, vector<32x96xbf16>
    %cst_17 = arith.constant dense<0.000000e+00> : vector<32x96xf32>
    %52 = tpu.matmul %50, %51, %cst_17 {dimension_numbers = #tpu.dot_dimension_numbers<[1], [0], [0], [1], [0, 0, 1, 1], [], []>} : vector<32x32xbf16>, vector<32x96xbf16>, vector<32x96xf32> -> vector<32x96xf32>
    %c0_18 = arith.constant 0 : index
    %c0_19 = arith.constant 0 : index
    %53 = vector.load %arg5[%c0_18, %c0_19] : memref<1x96xf32, #tpu.memory_space<vmem>>, vector<1x96xf32>
    %54 = vector.broadcast %53 : vector<1x96xf32> to vector<32x96xf32>
    %55 = arith.addf %52, %54 : vector<32x96xf32>
    %56 = vector.extract_strided_slice %55 {offsets = [0, 0], sizes = [32, 32], strides = [1, 1]} : vector<32x96xf32> to vector<32x32xf32>
    %cst_20 = arith.constant 0.353553385 : f32
    %57 = vector.broadcast %cst_20 : f32 to vector<32x32xf32>
    %58 = arith.mulf %56, %57 : vector<32x32xf32>
    %59 = vector.extract_strided_slice %55 {offsets = [0, 32], sizes = [32, 32], strides = [1, 1]} : vector<32x96xf32> to vector<32x32xf32>
    %60 = vector.extract_strided_slice %55 {offsets = [0, 64], sizes = [32, 32], strides = [1, 1]} : vector<32x96xf32> to vector<32x32xf32>
    %61 = vector.extract_strided_slice %58 {offsets = [0, 0], sizes = [16, 8], strides = [1, 1]} : vector<32x32xf32> to vector<16x8xf32>
    %62 = vector.extract_strided_slice %59 {offsets = [0, 0], sizes = [16, 8], strides = [1, 1]} : vector<32x32xf32> to vector<16x8xf32>
    %63 = vector.extract_strided_slice %60 {offsets = [0, 0], sizes = [16, 8], strides = [1, 1]} : vector<32x32xf32> to vector<16x8xf32>
    %cst_21 = arith.constant dense<0.000000e+00> : vector<16x16xf32>
    %64 = tpu.matmul %61, %62, %cst_21 {dimension_numbers = #tpu.dot_dimension_numbers<[1], [1], [0], [0], [0, 0, 1, 0], [], []>} : vector<16x8xf32>, vector<16x8xf32>, vector<16x16xf32> -> vector<16x16xf32>
    %cst_22 = arith.constant dense<0xFF800000> : vector<16xf32>
    %65 = vector.multi_reduction <maximumf>, %64, %cst_22 [1] : vector<16x16xf32> to vector<16xf32>
    %66 = vector.shape_cast %65 : vector<16xf32> to vector<16x1xf32>
    %67 = vector.broadcast %66 : vector<16x1xf32> to vector<16x16xf32>
    %68 = arith.subf %64, %67 : vector<16x16xf32>
    %69 = math.exp %68 : vector<16x16xf32>
    %cst_23 = arith.constant dense<0.000000e+00> : vector<16xf32>
    %70 = vector.multi_reduction <add>, %69, %cst_23 [1] : vector<16x16xf32> to vector<16xf32>
    %71 = vector.shape_cast %70 : vector<16xf32> to vector<16x1xf32>
    %72 = tpu.reciprocal %71 {approx = true} : vector<16x1xf32> -> vector<16x1xf32>
    %73 = vector.broadcast %72 : vector<16x1xf32> to vector<16x16xf32>
    %74 = arith.mulf %69, %73 : vector<16x16xf32>
    %cst_24 = arith.constant dense<0.000000e+00> : vector<16x8xf32>
    %75 = tpu.matmul %74, %63, %cst_24 {dimension_numbers = #tpu.dot_dimension_numbers<[1], [0], [0], [1], [0, 0, 1, 1], [], []>} : vector<16x16xf32>, vector<16x8xf32>, vector<16x8xf32> -> vector<16x8xf32>
    %76 = vector.extract_strided_slice %58 {offsets = [0, 8], sizes = [16, 8], strides = [1, 1]} : vector<32x32xf32> to vector<16x8xf32>
    %77 = vector.extract_strided_slice %59 {offsets = [0, 8], sizes = [16, 8], strides = [1, 1]} : vector<32x32xf32> to vector<16x8xf32>
    %78 = vector.extract_strided_slice %60 {offsets = [0, 8], sizes = [16, 8], strides = [1, 1]} : vector<32x32xf32> to vector<16x8xf32>
    %cst_25 = arith.constant dense<0.000000e+00> : vector<16x16xf32>
    %79 = tpu.matmul %76, %77, %cst_25 {dimension_numbers = #tpu.dot_dimension_numbers<[1], [1], [0], [0], [0, 0, 1, 0], [], []>} : vector<16x8xf32>, vector<16x8xf32>, vector<16x16xf32> -> vector<16x16xf32>
    %cst_26 = arith.constant dense<0xFF800000> : vector<16xf32>
    %80 = vector.multi_reduction <maximumf>, %79, %cst_26 [1] : vector<16x16xf32> to vector<16xf32>
    %81 = vector.shape_cast %80 : vector<16xf32> to vector<16x1xf32>
    %82 = vector.broadcast %81 : vector<16x1xf32> to vector<16x16xf32>
    %83 = arith.subf %79, %82 : vector<16x16xf32>
    %84 = math.exp %83 : vector<16x16xf32>
    %cst_27 = arith.constant dense<0.000000e+00> : vector<16xf32>
    %85 = vector.multi_reduction <add>, %84, %cst_27 [1] : vector<16x16xf32> to vector<16xf32>
    %86 = vector.shape_cast %85 : vector<16xf32> to vector<16x1xf32>
    %87 = tpu.reciprocal %86 {approx = true} : vector<16x1xf32> -> vector<16x1xf32>
    %88 = vector.broadcast %87 : vector<16x1xf32> to vector<16x16xf32>
    %89 = arith.mulf %84, %88 : vector<16x16xf32>
    %cst_28 = arith.constant dense<0.000000e+00> : vector<16x8xf32>
    %90 = tpu.matmul %89, %78, %cst_28 {dimension_numbers = #tpu.dot_dimension_numbers<[1], [0], [0], [1], [0, 0, 1, 1], [], []>} : vector<16x16xf32>, vector<16x8xf32>, vector<16x8xf32> -> vector<16x8xf32>
    %91 = vector.extract_strided_slice %58 {offsets = [0, 16], sizes = [16, 8], strides = [1, 1]} : vector<32x32xf32> to vector<16x8xf32>
    %92 = vector.extract_strided_slice %59 {offsets = [0, 16], sizes = [16, 8], strides = [1, 1]} : vector<32x32xf32> to vector<16x8xf32>
    %93 = vector.extract_strided_slice %60 {offsets = [0, 16], sizes = [16, 8], strides = [1, 1]} : vector<32x32xf32> to vector<16x8xf32>
    %cst_29 = arith.constant dense<0.000000e+00> : vector<16x16xf32>
    %94 = tpu.matmul %91, %92, %cst_29 {dimension_numbers = #tpu.dot_dimension_numbers<[1], [1], [0], [0], [0, 0, 1, 0], [], []>} : vector<16x8xf32>, vector<16x8xf32>, vector<16x16xf32> -> vector<16x16xf32>
    %cst_30 = arith.constant dense<0xFF800000> : vector<16xf32>
    %95 = vector.multi_reduction <maximumf>, %94, %cst_30 [1] : vector<16x16xf32> to vector<16xf32>
    %96 = vector.shape_cast %95 : vector<16xf32> to vector<16x1xf32>
    %97 = vector.broadcast %96 : vector<16x1xf32> to vector<16x16xf32>
    %98 = arith.subf %94, %97 : vector<16x16xf32>
    %99 = math.exp %98 : vector<16x16xf32>
    %cst_31 = arith.constant dense<0.000000e+00> : vector<16xf32>
    %100 = vector.multi_reduction <add>, %99, %cst_31 [1] : vector<16x16xf32> to vector<16xf32>
    %101 = vector.shape_cast %100 : vector<16xf32> to vector<16x1xf32>
    %102 = tpu.reciprocal %101 {approx = true} : vector<16x1xf32> -> vector<16x1xf32>
    %103 = vector.broadcast %102 : vector<16x1xf32> to vector<16x16xf32>
    %104 = arith.mulf %99, %103 : vector<16x16xf32>
    %cst_32 = arith.constant dense<0.000000e+00> : vector<16x8xf32>
    %105 = tpu.matmul %104, %93, %cst_32 {dimension_numbers = #tpu.dot_dimension_numbers<[1], [0], [0], [1], [0, 0, 1, 1], [], []>} : vector<16x16xf32>, vector<16x8xf32>, vector<16x8xf32> -> vector<16x8xf32>
    %106 = vector.extract_strided_slice %58 {offsets = [0, 24], sizes = [16, 8], strides = [1, 1]} : vector<32x32xf32> to vector<16x8xf32>
    %107 = vector.extract_strided_slice %59 {offsets = [0, 24], sizes = [16, 8], strides = [1, 1]} : vector<32x32xf32> to vector<16x8xf32>
    %108 = vector.extract_strided_slice %60 {offsets = [0, 24], sizes = [16, 8], strides = [1, 1]} : vector<32x32xf32> to vector<16x8xf32>
    %cst_33 = arith.constant dense<0.000000e+00> : vector<16x16xf32>
    %109 = tpu.matmul %106, %107, %cst_33 {dimension_numbers = #tpu.dot_dimension_numbers<[1], [1], [0], [0], [0, 0, 1, 0], [], []>} : vector<16x8xf32>, vector<16x8xf32>, vector<16x16xf32> -> vector<16x16xf32>
    %cst_34 = arith.constant dense<0xFF800000> : vector<16xf32>
    %110 = vector.multi_reduction <maximumf>, %109, %cst_34 [1] : vector<16x16xf32> to vector<16xf32>
    %111 = vector.shape_cast %110 : vector<16xf32> to vector<16x1xf32>
    %112 = vector.broadcast %111 : vector<16x1xf32> to vector<16x16xf32>
    %113 = arith.subf %109, %112 : vector<16x16xf32>
    %114 = math.exp %113 : vector<16x16xf32>
    %cst_35 = arith.constant dense<0.000000e+00> : vector<16xf32>
    %115 = vector.multi_reduction <add>, %114, %cst_35 [1] : vector<16x16xf32> to vector<16xf32>
    %116 = vector.shape_cast %115 : vector<16xf32> to vector<16x1xf32>
    %117 = tpu.reciprocal %116 {approx = true} : vector<16x1xf32> -> vector<16x1xf32>
    %118 = vector.broadcast %117 : vector<16x1xf32> to vector<16x16xf32>
    %119 = arith.mulf %114, %118 : vector<16x16xf32>
    %cst_36 = arith.constant dense<0.000000e+00> : vector<16x8xf32>
    %120 = tpu.matmul %119, %108, %cst_36 {dimension_numbers = #tpu.dot_dimension_numbers<[1], [0], [0], [1], [0, 0, 1, 1], [], []>} : vector<16x16xf32>, vector<16x8xf32>, vector<16x8xf32> -> vector<16x8xf32>
    %121 = tpu.concatenate %75, %90, %105, %120 in 1 : vector<16x8xf32>, vector<16x8xf32>, vector<16x8xf32>, vector<16x8xf32> -> vector<16x32xf32>
    %122 = vector.extract_strided_slice %58 {offsets = [16, 0], sizes = [16, 8], strides = [1, 1]} : vector<32x32xf32> to vector<16x8xf32>
    %123 = vector.extract_strided_slice %59 {offsets = [16, 0], sizes = [16, 8], strides = [1, 1]} : vector<32x32xf32> to vector<16x8xf32>
    %124 = vector.extract_strided_slice %60 {offsets = [16, 0], sizes = [16, 8], strides = [1, 1]} : vector<32x32xf32> to vector<16x8xf32>
    %cst_37 = arith.constant dense<0.000000e+00> : vector<16x16xf32>
    %125 = tpu.matmul %122, %123, %cst_37 {dimension_numbers = #tpu.dot_dimension_numbers<[1], [1], [0], [0], [0, 0, 1, 0], [], []>} : vector<16x8xf32>, vector<16x8xf32>, vector<16x16xf32> -> vector<16x16xf32>
    %cst_38 = arith.constant dense<0xFF800000> : vector<16xf32>
    %126 = vector.multi_reduction <maximumf>, %125, %cst_38 [1] : vector<16x16xf32> to vector<16xf32>
    %127 = vector.shape_cast %126 : vector<16xf32> to vector<16x1xf32>
    %128 = vector.broadcast %127 : vector<16x1xf32> to vector<16x16xf32>
    %129 = arith.subf %125, %128 : vector<16x16xf32>
    %130 = math.exp %129 : vector<16x16xf32>
    %cst_39 = arith.constant dense<0.000000e+00> : vector<16xf32>
    %131 = vector.multi_reduction <add>, %130, %cst_39 [1] : vector<16x16xf32> to vector<16xf32>
    %132 = vector.shape_cast %131 : vector<16xf32> to vector<16x1xf32>
    %133 = tpu.reciprocal %132 {approx = true} : vector<16x1xf32> -> vector<16x1xf32>
    %134 = vector.broadcast %133 : vector<16x1xf32> to vector<16x16xf32>
    %135 = arith.mulf %130, %134 : vector<16x16xf32>
    %cst_40 = arith.constant dense<0.000000e+00> : vector<16x8xf32>
    %136 = tpu.matmul %135, %124, %cst_40 {dimension_numbers = #tpu.dot_dimension_numbers<[1], [0], [0], [1], [0, 0, 1, 1], [], []>} : vector<16x16xf32>, vector<16x8xf32>, vector<16x8xf32> -> vector<16x8xf32>
    %137 = vector.extract_strided_slice %58 {offsets = [16, 8], sizes = [16, 8], strides = [1, 1]} : vector<32x32xf32> to vector<16x8xf32>
    %138 = vector.extract_strided_slice %59 {offsets = [16, 8], sizes = [16, 8], strides = [1, 1]} : vector<32x32xf32> to vector<16x8xf32>
    %139 = vector.extract_strided_slice %60 {offsets = [16, 8], sizes = [16, 8], strides = [1, 1]} : vector<32x32xf32> to vector<16x8xf32>
    %cst_41 = arith.constant dense<0.000000e+00> : vector<16x16xf32>
    %140 = tpu.matmul %137, %138, %cst_41 {dimension_numbers = #tpu.dot_dimension_numbers<[1], [1], [0], [0], [0, 0, 1, 0], [], []>} : vector<16x8xf32>, vector<16x8xf32>, vector<16x16xf32> -> vector<16x16xf32>
    %cst_42 = arith.constant dense<0xFF800000> : vector<16xf32>
    %141 = vector.multi_reduction <maximumf>, %140, %cst_42 [1] : vector<16x16xf32> to vector<16xf32>
    %142 = vector.shape_cast %141 : vector<16xf32> to vector<16x1xf32>
    %143 = vector.broadcast %142 : vector<16x1xf32> to vector<16x16xf32>
    %144 = arith.subf %140, %143 : vector<16x16xf32>
    %145 = math.exp %144 : vector<16x16xf32>
    %cst_43 = arith.constant dense<0.000000e+00> : vector<16xf32>
    %146 = vector.multi_reduction <add>, %145, %cst_43 [1] : vector<16x16xf32> to vector<16xf32>
    %147 = vector.shape_cast %146 : vector<16xf32> to vector<16x1xf32>
    %148 = tpu.reciprocal %147 {approx = true} : vector<16x1xf32> -> vector<16x1xf32>
    %149 = vector.broadcast %148 : vector<16x1xf32> to vector<16x16xf32>
    %150 = arith.mulf %145, %149 : vector<16x16xf32>
    %cst_44 = arith.constant dense<0.000000e+00> : vector<16x8xf32>
    %151 = tpu.matmul %150, %139, %cst_44 {dimension_numbers = #tpu.dot_dimension_numbers<[1], [0], [0], [1], [0, 0, 1, 1], [], []>} : vector<16x16xf32>, vector<16x8xf32>, vector<16x8xf32> -> vector<16x8xf32>
    %152 = vector.extract_strided_slice %58 {offsets = [16, 16], sizes = [16, 8], strides = [1, 1]} : vector<32x32xf32> to vector<16x8xf32>
    %153 = vector.extract_strided_slice %59 {offsets = [16, 16], sizes = [16, 8], strides = [1, 1]} : vector<32x32xf32> to vector<16x8xf32>
    %154 = vector.extract_strided_slice %60 {offsets = [16, 16], sizes = [16, 8], strides = [1, 1]} : vector<32x32xf32> to vector<16x8xf32>
    %cst_45 = arith.constant dense<0.000000e+00> : vector<16x16xf32>
    %155 = tpu.matmul %152, %153, %cst_45 {dimension_numbers = #tpu.dot_dimension_numbers<[1], [1], [0], [0], [0, 0, 1, 0], [], []>} : vector<16x8xf32>, vector<16x8xf32>, vector<16x16xf32> -> vector<16x16xf32>
    %cst_46 = arith.constant dense<0xFF800000> : vector<16xf32>
    %156 = vector.multi_reduction <maximumf>, %155, %cst_46 [1] : vector<16x16xf32> to vector<16xf32>
    %157 = vector.shape_cast %156 : vector<16xf32> to vector<16x1xf32>
    %158 = vector.broadcast %157 : vector<16x1xf32> to vector<16x16xf32>
    %159 = arith.subf %155, %158 : vector<16x16xf32>
    %160 = math.exp %159 : vector<16x16xf32>
    %cst_47 = arith.constant dense<0.000000e+00> : vector<16xf32>
    %161 = vector.multi_reduction <add>, %160, %cst_47 [1] : vector<16x16xf32> to vector<16xf32>
    %162 = vector.shape_cast %161 : vector<16xf32> to vector<16x1xf32>
    %163 = tpu.reciprocal %162 {approx = true} : vector<16x1xf32> -> vector<16x1xf32>
    %164 = vector.broadcast %163 : vector<16x1xf32> to vector<16x16xf32>
    %165 = arith.mulf %160, %164 : vector<16x16xf32>
    %cst_48 = arith.constant dense<0.000000e+00> : vector<16x8xf32>
    %166 = tpu.matmul %165, %154, %cst_48 {dimension_numbers = #tpu.dot_dimension_numbers<[1], [0], [0], [1], [0, 0, 1, 1], [], []>} : vector<16x16xf32>, vector<16x8xf32>, vector<16x8xf32> -> vector<16x8xf32>
    %167 = vector.extract_strided_slice %58 {offsets = [16, 24], sizes = [16, 8], strides = [1, 1]} : vector<32x32xf32> to vector<16x8xf32>
    %168 = vector.extract_strided_slice %59 {offsets = [16, 24], sizes = [16, 8], strides = [1, 1]} : vector<32x32xf32> to vector<16x8xf32>
    %169 = vector.extract_strided_slice %60 {offsets = [16, 24], sizes = [16, 8], strides = [1, 1]} : vector<32x32xf32> to vector<16x8xf32>
    %cst_49 = arith.constant dense<0.000000e+00> : vector<16x16xf32>
    %170 = tpu.matmul %167, %168, %cst_49 {dimension_numbers = #tpu.dot_dimension_numbers<[1], [1], [0], [0], [0, 0, 1, 0], [], []>} : vector<16x8xf32>, vector<16x8xf32>, vector<16x16xf32> -> vector<16x16xf32>
    %cst_50 = arith.constant dense<0xFF800000> : vector<16xf32>
    %171 = vector.multi_reduction <maximumf>, %170, %cst_50 [1] : vector<16x16xf32> to vector<16xf32>
    %172 = vector.shape_cast %171 : vector<16xf32> to vector<16x1xf32>
    %173 = vector.broadcast %172 : vector<16x1xf32> to vector<16x16xf32>
    %174 = arith.subf %170, %173 : vector<16x16xf32>
    %175 = math.exp %174 : vector<16x16xf32>
    %cst_51 = arith.constant dense<0.000000e+00> : vector<16xf32>
    %176 = vector.multi_reduction <add>, %175, %cst_51 [1] : vector<16x16xf32> to vector<16xf32>
    %177 = vector.shape_cast %176 : vector<16xf32> to vector<16x1xf32>
    %178 = tpu.reciprocal %177 {approx = true} : vector<16x1xf32> -> vector<16x1xf32>
    %179 = vector.broadcast %178 : vector<16x1xf32> to vector<16x16xf32>
    %180 = arith.mulf %175, %179 : vector<16x16xf32>
    %cst_52 = arith.constant dense<0.000000e+00> : vector<16x8xf32>
    %181 = tpu.matmul %180, %169, %cst_52 {dimension_numbers = #tpu.dot_dimension_numbers<[1], [0], [0], [1], [0, 0, 1, 1], [], []>} : vector<16x16xf32>, vector<16x8xf32>, vector<16x8xf32> -> vector<16x8xf32>
    %182 = tpu.concatenate %136, %151, %166, %181 in 1 : vector<16x8xf32>, vector<16x8xf32>, vector<16x8xf32>, vector<16x8xf32> -> vector<16x32xf32>
    %183 = tpu.concatenate %121, %182 in 0 : vector<16x32xf32>, vector<16x32xf32> -> vector<32x32xf32>
    %184 = arith.truncf %183 : vector<32x32xf32> to vector<32x32xbf16>
    %c0_53 = arith.constant 0 : index
    %c0_54 = arith.constant 0 : index
    %185 = vector.load %arg6[%c0_53, %c0_54] : memref<32x32xbf16, #tpu.memory_space<vmem>>, vector<32x32xbf16>
    %cst_55 = arith.constant dense<0.000000e+00> : vector<32x32xf32>
    %186 = tpu.matmul %184, %185, %cst_55 {dimension_numbers = #tpu.dot_dimension_numbers<[1], [0], [0], [1], [0, 0, 1, 1], [], []>} : vector<32x32xbf16>, vector<32x32xbf16>, vector<32x32xf32> -> vector<32x32xf32>
    %c0_56 = arith.constant 0 : index
    %c0_57 = arith.constant 0 : index
    %187 = vector.load %arg7[%c0_56, %c0_57] : memref<1x32xf32, #tpu.memory_space<vmem>>, vector<1x32xf32>
    %188 = vector.broadcast %187 : vector<1x32xf32> to vector<32x32xf32>
    %189 = arith.addf %186, %188 : vector<32x32xf32>
    %190 = arith.mulf %24, %189 : vector<32x32xf32>
    %191 = arith.addf %0, %190 : vector<32x32xf32>
    %cst_58 = arith.constant dense<0.000000e+00> : vector<32xf32>
    %192 = vector.multi_reduction <add>, %191, %cst_58 [1] : vector<32x32xf32> to vector<32xf32>
    %193 = vector.shape_cast %192 : vector<32xf32> to vector<32x1xf32>
    %cst_59 = arith.constant 3.200000e+01 : f32
    %194 = vector.broadcast %cst_59 : f32 to vector<32x1xf32>
    %195 = arith.divf %193, %194 : vector<32x1xf32>
    %196 = vector.broadcast %195 : vector<32x1xf32> to vector<32x32xf32>
    %197 = arith.subf %191, %196 : vector<32x32xf32>
    %198 = arith.mulf %197, %197 : vector<32x32xf32>
    %cst_60 = arith.constant dense<0.000000e+00> : vector<32xf32>
    %199 = vector.multi_reduction <add>, %198, %cst_60 [1] : vector<32x32xf32> to vector<32xf32>
    %200 = vector.shape_cast %199 : vector<32xf32> to vector<32x1xf32>
    %cst_61 = arith.constant 3.200000e+01 : f32
    %201 = vector.broadcast %cst_61 : f32 to vector<32x1xf32>
    %202 = arith.divf %200, %201 : vector<32x1xf32>
    %203 = vector.broadcast %195 : vector<32x1xf32> to vector<32x32xf32>
    %204 = arith.subf %191, %203 : vector<32x32xf32>
    %cst_62 = arith.constant 9.99999997E-7 : f32
    %205 = vector.broadcast %cst_62 : f32 to vector<32x1xf32>
    %206 = arith.addf %202, %205 : vector<32x1xf32>
    %207 = math.rsqrt %206 : vector<32x1xf32>
    %208 = vector.broadcast %207 : vector<32x1xf32> to vector<32x32xf32>
    %209 = arith.mulf %204, %208 : vector<32x32xf32>
    %cst_63 = arith.constant 1.000000e+00 : f32
    %210 = vector.broadcast %cst_63 : f32 to vector<32x32xf32>
    %211 = arith.addf %210, %26 : vector<32x32xf32>
    %212 = arith.mulf %209, %211 : vector<32x32xf32>
    %213 = arith.addf %212, %25 : vector<32x32xf32>
    %214 = arith.truncf %213 : vector<32x32xf32> to vector<32x32xbf16>
    %c0_64 = arith.constant 0 : index
    %c0_65 = arith.constant 0 : index
    %215 = vector.load %arg8[%c0_64, %c0_65] : memref<32x128xbf16, #tpu.memory_space<vmem>>, vector<32x128xbf16>
    %cst_66 = arith.constant dense<0.000000e+00> : vector<32x128xf32>
    %216 = tpu.matmul %214, %215, %cst_66 {dimension_numbers = #tpu.dot_dimension_numbers<[1], [0], [0], [1], [0, 0, 1, 1], [], []>} : vector<32x32xbf16>, vector<32x128xbf16>, vector<32x128xf32> -> vector<32x128xf32>
    %c0_67 = arith.constant 0 : index
    %c0_68 = arith.constant 0 : index
    %217 = vector.load %arg9[%c0_67, %c0_68] : memref<1x128xf32, #tpu.memory_space<vmem>>, vector<1x128xf32>
    %218 = vector.broadcast %217 : vector<1x128xf32> to vector<32x128xf32>
    %219 = arith.addf %216, %218 : vector<32x128xf32>
    %cst_69 = arith.constant 5.000000e-01 : f32
    %220 = vector.broadcast %cst_69 : f32 to vector<32x128xf32>
    %221 = arith.mulf %220, %219 : vector<32x128xf32>
    %cst_70 = arith.constant 4.471500e-02 : f32
    %222 = vector.broadcast %cst_70 : f32 to vector<32x128xf32>
    %223 = arith.mulf %222, %219 : vector<32x128xf32>
    %224 = arith.mulf %223, %219 : vector<32x128xf32>
    %225 = arith.mulf %224, %219 : vector<32x128xf32>
    %226 = arith.addf %219, %225 : vector<32x128xf32>
    %cst_71 = arith.constant 0.797884583 : f32
    %227 = vector.broadcast %cst_71 : f32 to vector<32x128xf32>
    %228 = arith.mulf %227, %226 : vector<32x128xf32>
    %229 = math.tanh %228 : vector<32x128xf32>
    %cst_72 = arith.constant 1.000000e+00 : f32
    %230 = vector.broadcast %cst_72 : f32 to vector<32x128xf32>
    %231 = arith.addf %230, %229 : vector<32x128xf32>
    %232 = arith.mulf %221, %231 : vector<32x128xf32>
    %233 = arith.truncf %232 : vector<32x128xf32> to vector<32x128xbf16>
    %c0_73 = arith.constant 0 : index
    %c0_74 = arith.constant 0 : index
    %234 = vector.load %arg10[%c0_73, %c0_74] : memref<128x32xbf16, #tpu.memory_space<vmem>>, vector<128x32xbf16>
    %cst_75 = arith.constant dense<0.000000e+00> : vector<32x32xf32>
    %235 = tpu.matmul %233, %234, %cst_75 {dimension_numbers = #tpu.dot_dimension_numbers<[1], [0], [0], [1], [0, 0, 1, 1], [], []>} : vector<32x128xbf16>, vector<128x32xbf16>, vector<32x32xf32> -> vector<32x32xf32>
    %c0_76 = arith.constant 0 : index
    %c0_77 = arith.constant 0 : index
    %236 = vector.load %arg11[%c0_76, %c0_77] : memref<1x32xf32, #tpu.memory_space<vmem>>, vector<1x32xf32>
    %237 = vector.broadcast %236 : vector<1x32xf32> to vector<32x32xf32>
    %238 = arith.addf %235, %237 : vector<32x32xf32>
    %239 = arith.mulf %27, %238 : vector<32x32xf32>
    %240 = arith.addf %191, %239 : vector<32x32xf32>
    %c0_78 = arith.constant 0 : index
    %c0_79 = arith.constant 0 : index
    %241 = vector.load %arg12[%c0_78, %c0_79] : memref<32x32xf32, #tpu.memory_space<vmem>>, vector<32x32xf32>
    tpu.vector_store %arg12[%c0_78, %c0_79], %240 {strides = array<i32>} : memref<32x32xf32, #tpu.memory_space<vmem>>, vector<32x32xf32>,
    return
  }
}

</mosaic_0001>

<bundles_post_ra>
// kernel: dit_forward.5
= control target key start
LH: loop header
LB: loop body
LE: loop exit
PB: predicated region body
PF: predicated region fallthrough
CT: control target
= control target key end

     0   :  { %vm59_vm0 = vcmask 261120   ;;  %v322_v3 = vmov 0.0   ;;  %vm323_vm1 = vmmov 0   ;;  %v103_v40 = vlaneseq  ;;  %s324_s14 = smov 96   ;;  %s426_s0 = inlined_call_operand.vmem [shape: f32[32,32], index: 0, kind: input, shape index: {}]   ;;  %s427_s2 = inlined_call_operand.vmem [shape: bf16[32,64], index: 2, kind: input, shape index: {}]   ;;  %s428_s1 = inlined_call_operand.vmem [shape: f32[2,32], index: 1, kind: input, shape index: {}]   ;;  %s429_s4 = inlined_call_operand.vmem [shape: bf16[32,27], index: 4, kind: input, shape index: {}]   ;;  %s430_s3 = inlined_call_operand.vmem [shape: f32[1,64], index: 3, kind: input, shape index: {}]   ;;  %s431_s5 = inlined_call_operand.vmem [shape: f32[1,27], index: 5, kind: input, shape index: {}]   ;;  %s432_s6 = inlined_call_operand.vmem [shape: f32[32,27], index: 6, kind: output, shape index: {}]  }
   0x1   :  { %v24_v0 = vld [vmem:[%s426_s0] sm:$0xff]  ;;  %v26_v1 = vld [vmem:[%s426_s0 + $0x10] sm:$0xff]  ;;  %v25_v2 = vld [vmem:[%s426_s0 + $0x8] sm:$0xff]  ;;  %287 = vmatprep.subr.bf16.mxu0 %v322_v3  ;;  %291 = vmatprep.mubr.msk.bf16.mxu0 %vm323_vm1, %v322_v3  ;;  %vm262_vm2 = vcmask 220160  }
   0x2   :  { %v111_v4 = vsel %vm59_vm0, %v24_v0, 0.0  ;;  %v117_v5 = vsel %vm59_vm0, %v26_v1, 0.0  ;;  %v27_v6 = vld [vmem:[%s426_s0 + $0x18] sm:$0xff]  ;;  %v306_v7 = vld [vmem:[%s427_s2] sm:$0xff]   ;;  %v114_v8 = vsel %vm59_vm0, %v25_v2, 0.0  ;;  %v307_v11 = vld [vmem:[%s427_s2 + $0x8] sm:$0xff]  }
   0x3   :  { %112 = vadd.xlane.f32.xlu0 %v111_v4  ;;  %118 = vadd.xlane.f32.xlu1 %v117_v5  ;;  %v120_v9 = vsel %vm59_vm0, %v27_v6, 0.0  ;;  %v28_v10 = vld [vmem:[%s428_s1] sm:$0x3]  ;;  %v104_v41 = vshrl.u32 %v103_v40, 7  ;;  %v309_v42 = vld [vmem:[%s429_s4 + $0x8] sm:$0xff]  }
   0x4   :  { %288 = vmatpush3.bf16.msra.mxu0 %v306_v7  ;;  %v29_v12 = vsub.f32 0.0, %v28_v10  ;;  %v308_v39 = vld [vmem:[%s429_s4] sm:$0xff]  }
   0x5   :  { %289 = vmatprep.subr.bf16.mxu0 %v322_v3  ;;  %295 = vmatprep.subr.bf16.mxu1 %v308_v39  ;;  %v271_v43 = vld [vmem:[%s430_s3] ss:$0 sm:$0xff]  ;;  %v105_v44 = vsub.s32 0, %v104_v41  ;;  %v109_v45 = vsub.s32 1, %v104_v41 }
   0x6   :  { %v30_v13 = vmul.f32 1.442695, %v29_v12  ;;  %296 = vmatpush3.bf16.msra.mxu1 %v308_v39 }
   0x7   :  { %115 = vadd.xlane.f32.xlu0 %v114_v8  ;;  %121 = vadd.xlane.f32.xlu1 %v120_v9 }
   0x8   :  { %290 = vmatpush3.bf16.msra.mxu0 %v307_v11  ;;  %310 = vpow2.f32 %v30_v13  ;;  %297 = vmatprep.subr.bf16.mxu1 %v309_v42 }
   0xa   :  { %298 = vmatpush3.bf16.msra.mxu1 %v309_v42 }
  0x12   :  { %v311_v14 = vpop.eup %310 }
  0x13   :  { %v32_v15 = vadd.f32 1.0, %v311_v14 }
  0x15   :  { %312 = vrcp.f32 %v32_v15 }
  0x1f   :  { %v313_v16 = vpop.eup %312 }
  0x20   :  { %v34_v17 = vmul.f32 %v313_v16, %v28_v10 }
  0x22   :  { %v35_v18 = vpack.c.bf16 %v34_v17, %v34_v17 }
  0x24   :  { %292 = vmatmul.mubr.msk.bf16.vlgmr.msra.gmra.mrb[0].mxu0 %vm59_vm0, %v35_v18 }
  0x90   :  { %v113_v19 = vpop.xlane.xlu0 %112  ;;  %v119_v20 = vpop.xlane.xlu1 %118 }
  0x91   :  { %v124_v21 = vmul.f32 0.03125, %v113_v19  ;;  %v126_v22 = vmul.f32 0.03125, %v119_v20 }
  0x93   :  { %v386_v23 = vsub.f32 %v24_v0, %v124_v21  ;;  %v388_v24 = vsub.f32 %v26_v1, %v126_v22 }
  0x94   :  { %v116_v25 = vpop.xlane.xlu0 %115  ;;  %v122_v26 = vpop.xlane.xlu1 %121 }
  0x95   :  { %v125_v27 = vmul.f32 0.03125, %v116_v25  ;;  %v127_v28 = vmul.f32 0.03125, %v122_v26  ;;  %v132_v29 = vmul.f32 %v386_v23, %v386_v23  ;;  %v134_v30 = vmul.f32 %v388_v24, %v388_v24 }
  0x97   :  { %v129_v31 = vsub.f32 %v25_v2, %v125_v27  ;;  %v131_v32 = vsub.f32 %v27_v6, %v127_v28  ;;  %v136_v33 = vsel %vm59_vm0, %v132_v29, 0.0  ;;  %v142_v34 = vsel %vm59_vm0, %v134_v30, 0.0 }
  0x98   :  { %137 = vadd.xlane.f32.xlu0 %v136_v33 }
  0x99   :  { %v133_v35 = vmul.f32 %v129_v31, %v129_v31  ;;  %v135_v36 = vmul.f32 %v131_v32, %v131_v32 }
  0x9b   :  { %v139_v37 = vsel %vm59_vm0, %v133_v35, 0.0  ;;  %v145_v38 = vsel %vm59_vm0, %v135_v36, 0.0 }
  0x9c   :  { %143 = vadd.xlane.f32.xlu0 %v142_v34  ;;  %140 = vadd.xlane.f32.xlu1 %v139_v37 }
  0xa0   :  { %146 = vadd.xlane.f32.xlu1 %v145_v38 }
  0xf7   :  { %v97_v46 = vpop.f32.mrb[0].mxu0 }
  0xf8   :  { %v98_v47 = vadd.f32 %v271_v43, %v97_v46  ;;  %v293_v48 = vpop.f32.mrb[1].mxu0 }
  0xf9   :  { %v100_v49 = vpop.f32.mrb[2].mxu0 }
  0xfa   :  { %v106_v50 = vrot.slane %v98_v47, %v105_v44  ;;  %v110_v51 = vrot.slane %v98_v47, %v109_v45  ;;  %v294_v52 = vpop.f32.mrb[3].mxu0 }
  0xfc   :  { %v164_v53 = vadd.f32 1.0, %v106_v50  ;;  %v165_v54 = vadd.f32 1.0, %v110_v51 }
  0xfe   :  { %168 = vrot.lane.b32.xlu0 %v164_v53, %s324_s14  ;;  %170 = vrot.lane.b32.xlu1 %v165_v54, %s324_s14 }
 0x125   :  { %v138_v55 = vpop.xlane.xlu0 %137 }
 0x126   :  { %v148_v58 = vmul.f32 0.03125, %v138_v55 }
 0x128   :  { %v152_v63 = vadd.f32 1e-06, %v148_v58 }
 0x129   :  { %v141_v56 = vpop.xlane.xlu1 %140  ;;  %v144_v57 = vpop.xlane.xlu0 %143 }
 0x12a   :  { %v149_v60 = vmul.f32 0.03125, %v141_v56  ;;  %v150_v61 = vmul.f32 0.03125, %v144_v57  ;;  %314 = vrsqrt.f32 %v152_v63 }
 0x12c   :  { %v153_v0 = vadd.f32 1e-06, %v149_v60  ;;  %v154_v1 = vadd.f32 1e-06, %v150_v61 }
 0x12d   :  { %v147_v59 = vpop.xlane.xlu1 %146 }
 0x12e   :  { %v151_v62 = vmul.f32 0.03125, %v147_v59  ;;  %316 = vrsqrt.f32 %v153_v0 }
 0x12f   :  { %318 = vrsqrt.f32 %v154_v1 }
 0x130   :  { %v155_v2 = vadd.f32 1e-06, %v151_v62 }
 0x132   :  { %320 = vrsqrt.f32 %v155_v2 }
 0x134   :  { %v315_v3 = vpop.eup %314 }
 0x135   :  { %v160_v9 = vmul.f32 %v315_v3, %v386_v23  ;;  %v275_v23 = vld [vmem:[%s431_s5] ss:$0 sm:$0xff] }
 0x138   :  { %v317_v4 = vpop.eup %316 }
 0x139   :  { %v319_v5 = vpop.eup %318  ;;  %v161_v10 = vmul.f32 %v317_v4, %v129_v31 }
 0x13a   :  { %v162_v8 = vmul.f32 %v319_v5, %v388_v24 }
 0x13c   :  { %v321_v6 = vpop.eup %320 }
 0x13d   :  { %v163_v7 = vmul.f32 %v321_v6, %v131_v32 }
 0x170   :  { %v171_v11 = vpop.permute.xlu1 %170  ;;  %v169_v12 = vpop.permute.xlu0 %168 }
 0x171   :  { %v176_v13 = vmul.f32 %v171_v11, %v162_v8  ;;  %v177_v14 = vmul.f32 %v171_v11, %v163_v7  ;;  %v174_v15 = vmul.f32 %v169_v12, %v160_v9  ;;  %v175_v16 = vmul.f32 %v169_v12, %v161_v10 }
 0x173   :  { %v180_v17 = vadd.f32 %v176_v13, %v110_v51  ;;  %v181_v18 = vadd.f32 %v177_v14, %v110_v51  ;;  %v178_v19 = vadd.f32 %v174_v15, %v106_v50  ;;  %v179_v20 = vadd.f32 %v175_v16, %v106_v50 }
 0x175   :  { %v183_v21 = vpack.c.bf16 %v181_v18, %v180_v17  ;;  %v182_v22 = vpack.c.bf16 %v179_v20, %v178_v19 }
 0x177   :  { %299 = vmatprep.mubr.msk.bf16.mxu1 %vm59_vm0, %v182_v22 }
 0x178   :  { %300 = vmatmul.mubr.msk.bf16.vlgmr.msra.gmra.mrb[0].mxu1 %vm59_vm0, %v183_v21 }
 0x24b   :  { %v301_v24 = vpop.f32.mrb[0].mxu1 }
 0x24c   :  { %v256_v25 = vadd.f32 %v301_v24, %v275_v23  ;;  %v247_v26 = vpop.f32.mrb[1].mxu1 }
 0x24d   :  { %v248_v27 = vadd.f32 %v275_v23, %v247_v26  ;;  %v302_v28 = vpop.f32.mrb[2].mxu1 }
 0x24e   :  { %265 = vst.msk [vmem:[%s432_s6 + $0x10] sm:$0xff] %vm262_vm2, %v256_v25  ;;  %v259_v29 = vadd.f32 %v302_v28, %v275_v23  ;;  %v250_v30 = vpop.f32.mrb[3].mxu1 }
 0x24f   :  { %263 = vst.msk [vmem:[%s432_s6] sm:$0xff] %vm262_vm2, %v248_v27  ;;  %v251_v31 = vadd.f32 %v275_v23, %v250_v30 }
 0x250   :  { %266 = vst.msk [vmem:[%s432_s6 + $0x18] sm:$0xff] %vm262_vm2, %v259_v29 }
 0x251   :  { %264 = vst.msk [vmem:[%s432_s6 + $0x8] sm:$0xff] %vm262_vm2, %v251_v31 }

// kernel: dit_forward.3
= control target key start
LH: loop header
LB: loop body
LE: loop exit
PB: predicated region body
PF: predicated region fallthrough
CT: control target
= control target key end

     0   :  { %vm90_vm0 = vcmask 261120   ;;  %v3087_v3 = vmov 0   ;;  %v60_v42 = vlaneseq  ;;  %vm314_vm1 = vcmask 64512   ;;  %s3090_s27 = smov 120   ;;  %s3091_s28 = smov 88   ;;  %s3641_s0 = inlined_call_operand.vmem [shape: f32[32,32], index: 0, kind: input, shape index: {}, may-alias: {0,12}]   ;;  %s3642_s2 = inlined_call_operand.vmem [shape: bf16[32,192], index: 2, kind: input, shape index: {}]   ;;  %s3643_s1 = inlined_call_operand.vmem [shape: f32[2,32], index: 1, kind: input, shape index: {}]   ;;  %s3644_s4 = inlined_call_operand.vmem [shape: bf16[32,96], index: 4, kind: input, shape index: {}]   ;;  %s3645_s3 = inlined_call_operand.vmem [shape: f32[1,192], index: 3, kind: input, shape index: {}]   ;;  %s3646_s5 = inlined_call_operand.vmem [shape: f32[1,96], index: 5, kind: input, shape index: {}]   ;;  %s3647_s6 = inlined_call_operand.vmem [shape: bf16[32,32], index: 6, kind: input, shape index: {}]   ;;  %s3648_s7 = inlined_call_operand.vmem [shape: f32[1,32], index: 7, kind: input, shape index: {}]   ;;  %s3649_s8 = inlined_call_operand.vmem [shape: bf16[32,128], index: 8, kind: input, shape index: {}]   ;;  %s3650_s10 = inlined_call_operand.vmem [shape: bf16[128,32], index: 10, kind: input, shape index: {}]   ;;  %s3651_s9 = inlined_call_operand.vmem [shape: f32[1,128], index: 9, kind: input, shape index: {}]   ;;  %s3652_s11 = inlined_call_operand.vmem [shape: f32[1,32], index: 11, kind: input, shape index: {}]   ;;  %s3653_s12 = inlined_call_operand.vmem [shape: f32[32,32], index: 12, kind: output, shape index: {}, may-alias: {0,12}]  }
   0x1   :  { %v42_v0 = vld [vmem:[%s3641_s0] sm:$0xff]  ;;  %v44_v1 = vld [vmem:[%s3641_s0 + $0x10] sm:$0xff]  ;;  %v43_v2 = vld [vmem:[%s3641_s0 + $0x8] sm:$0xff]  ;;  %126 = vmatprep.mubr.bf16.mxu0 %v3087_v3  ;;  %vm400_vm3 = vcmask 130048   ;;  %s3092_s29 = smov 56   ;;  %s3093_s30 = smov 112  }
   0x2   :  { %v153_v4 = vsel %vm90_vm0, %v42_v0, 0.0  ;;  %v159_v5 = vsel %vm90_vm0, %v44_v1, 0.0  ;;  %v45_v6 = vld [vmem:[%s3641_s0 + $0x18] sm:$0xff]  ;;  %v2970_v7 = vld [vmem:[%s3642_s2 + $0x4] ss:$8 sps:$4 sm:$0xff]   ;;  %v156_v9 = vsel %vm90_vm0, %v43_v2, 0.0  ;;  %vm3267_vm2 = vmpackc.low %vm314_vm1, %vm314_vm1 }
   0x3   :  { %154 = vadd.xlane.f32.xlu0 %v153_v4  ;;  %160 = vadd.xlane.f32.xlu1 %v159_v5  ;;  %v2972_v8 = vld [vmem:[%s3642_s2] ss:$8 sps:$4 sm:$0xff]   ;;  %v162_v10 = vsel %vm90_vm0, %v45_v6, 0.0  ;;  %v2973_v11 = vld [vmem:[%s3642_s2 + $0x14] ss:$8 sps:$4 sm:$0xff]   ;;  %v61_v43 = vshrl.u32 %v60_v42, 7 }
   0x4   :  { %94 = vmatprep.subr.bf16.mxu0 %v2970_v7  ;;  %v46_v12 = vld [vmem:[%s3643_s1] sm:$0x3]  ;;  %v2975_v13 = vld [vmem:[%s3642_s2 + $0x10] ss:$8 sps:$4 sm:$0xff]   ;;  %v2977_v46 = vld [vmem:[%s3644_s4 + $0x8] sm:$0xff]   ;;  %s3094_s13 = smov 80  }
   0x5   :  { %95 = vmatpush1.bf16.msra.mxu0 %v2972_v8  ;;  %v47_v14 = vsub.f32 0.0, %v46_v12  ;;  %v2976_v41 = vld [vmem:[%s3644_s4] sm:$0xff]   ;;  %v3215_v44 = vsub.s32 0, %v61_v43  ;;  %v3224_v49 = vsub.s32 1, %v61_v43  ;;  %s3088_s4 = smov 96   ;;  %s3095_s14 = smov 48  }
   0x6   :  { %96 = vmatprep.subr.bf16.mxu0 %v2973_v11  ;;  %v58_v45 = vld [vmem:[%s3645_s3] sm:$0x3]  ;;  %s3096_s15 = smov 104   ;;  %s3097_s16 = smov 72   ;;  %vm1138_vm4 = vcmask 195584  }
   0x7   :  { %157 = vadd.xlane.f32.xlu0 %v156_v9  ;;  %163 = vadd.xlane.f32.xlu1 %v162_v10  ;;  %v48_v15 = vmul.f32 1.442695, %v47_v14  ;;  %v63_v47 = vrot.slane %v58_v45, %v3215_v44  ;;  %s3098_s17 = smov 40   ;;  %s3099_s18 = smov 16  }
   0x8   :  { %s3100_s19 = smov 8   ;;  %s3101_s20 = smov 24  }
   0x9   :  { %97 = vmatpush1.bf16.msra.mxu0 %v2975_v13  ;;  %2990 = vpow2.f32 %v48_v15 }
   0xa   :  { %2608 = vmatprep.subr.bf16.mxu0 %v2976_v41 }
  0x13   :  { %v2991_v16 = vpop.eup %2990 }
  0x14   :  { %v50_v17 = vadd.f32 1.0, %v2991_v16 }
  0x16   :  { %2992 = vrcp.f32 %v50_v17 }
  0x20   :  { %v2993_v18 = vpop.eup %2992 }
  0x21   :  { %v52_v19 = vmul.f32 %v2993_v18, %v46_v12 }
  0x23   :  { %v53_v20 = vpack.c.bf16 %v52_v19, %v52_v19 }
  0x25   :  { %2449 = vmatmul.mubr.msk.bf16.vlgmr.msra.gmra.mrb[0].mxu0 %vm90_vm0, %v53_v20 }
  0x26   :  { %2609 = vmatpush3.bf16.msra.mxu0 %v2976_v41 }
  0x27   :  { %2610 = vmatprep.subr.bf16.mxu0 %v2977_v46 }
  0x2a   :  { %2611 = vmatpush3.bf16.msra.mxu0 %v2977_v46 }
  0x90   :  { %v155_v21 = vpop.xlane.xlu0 %154  ;;  %v161_v22 = vpop.xlane.xlu1 %160 }
  0x91   :  { %v166_v23 = vmul.f32 0.03125, %v155_v21  ;;  %v168_v24 = vmul.f32 0.03125, %v161_v22 }
  0x93   :  { %v3200_v25 = vsub.f32 %v42_v0, %v166_v23  ;;  %v3202_v26 = vsub.f32 %v44_v1, %v168_v24 }
  0x94   :  { %v158_v27 = vpop.xlane.xlu0 %157  ;;  %v164_v28 = vpop.xlane.xlu1 %163 }
  0x95   :  { %v167_v29 = vmul.f32 0.03125, %v158_v27  ;;  %v169_v30 = vmul.f32 0.03125, %v164_v28  ;;  %v174_v31 = vmul.f32 %v3200_v25, %v3200_v25  ;;  %v176_v32 = vmul.f32 %v3202_v26, %v3202_v26 }
  0x97   :  { %v171_v33 = vsub.f32 %v43_v2, %v167_v29  ;;  %v173_v34 = vsub.f32 %v45_v6, %v169_v30  ;;  %v178_v35 = vsel %vm90_vm0, %v174_v31, 0.0  ;;  %v184_v36 = vsel %vm90_vm0, %v176_v32, 0.0 }
  0x98   :  { %179 = vadd.xlane.f32.xlu0 %v178_v35 }
  0x99   :  { %v175_v37 = vmul.f32 %v171_v33, %v171_v33  ;;  %v177_v38 = vmul.f32 %v173_v34, %v173_v34 }
  0x9b   :  { %v181_v39 = vsel %vm90_vm0, %v175_v37, 0.0  ;;  %v187_v40 = vsel %vm90_vm0, %v177_v38, 0.0 }
  0x9c   :  { %185 = vadd.xlane.f32.xlu0 %v184_v36  ;;  %182 = vadd.xlane.f32.xlu1 %v181_v39 }
  0xa0   :  { %188 = vadd.xlane.f32.xlu1 %v187_v40 }
  0xf8   :  { %v128_v48 = vpop.f32.mrb[0].mxu0 }
  0xf9   :  { %v129_v50 = vadd.f32 %v128_v48, %v63_v47  ;;  %v3226_v51 = vpop.f32.mrb[1].mxu0 }
  0xfa   :  { %v132_v52 = vpop.f32.mrb[2].mxu0 }
  0xfb   :  { %v3229_v53 = vrot.slane %v129_v50, %v3215_v44  ;;  %v3232_v54 = vrot.slane %v129_v50, %v3224_v49  ;;  %v133_v55 = vpop.f32.mrb[3].mxu0 }
  0xfd   :  { %v206_v56 = vadd.f32 1.0, %v3229_v53  ;;  %v207_v57 = vadd.f32 1.0, %v3232_v54 }
  0xff   :  { %210 = vrot.lane.b32.xlu0 %v206_v56, %s3088_s4  ;;  %212 = vrot.lane.b32.xlu1 %v207_v57, %s3088_s4 }
 0x125   :  { %v180_v58 = vpop.xlane.xlu0 %179 }
 0x126   :  { %v190_v61 = vmul.f32 0.03125, %v180_v58 }
 0x128   :  { %v194_v2 = vadd.f32 1e-06, %v190_v61 }
 0x129   :  { %v183_v59 = vpop.xlane.xlu1 %182  ;;  %v186_v60 = vpop.xlane.xlu0 %185 }
 0x12a   :  { %v191_v63 = vmul.f32 0.03125, %v183_v59  ;;  %v192_v0 = vmul.f32 0.03125, %v186_v60  ;;  %2994 = vrsqrt.f32 %v194_v2 }
 0x12c   :  { %v195_v3 = vadd.f32 1e-06, %v191_v63  ;;  %v196_v4 = vadd.f32 1e-06, %v192_v0 }
 0x12d   :  { %v189_v62 = vpop.xlane.xlu1 %188 }
 0x12e   :  { %v193_v1 = vmul.f32 0.03125, %v189_v62  ;;  %2996 = vrsqrt.f32 %v195_v3 }
 0x12f   :  { %2998 = vrsqrt.f32 %v196_v4 }
 0x130   :  { %v197_v5 = vadd.f32 1e-06, %v193_v1 }
 0x132   :  { %3000 = vrsqrt.f32 %v197_v5 }
 0x134   :  { %v2995_v6 = vpop.eup %2994 }
 0x135   :  { %v202_v12 = vmul.f32 %v2995_v6, %v3200_v25  ;;  %v2450_v25 = vld [vmem:[%s3646_s5] ss:$0 sm:$0xff]  ;;  %s3089_s5 = smov 64  }
 0x138   :  { %v2997_v7 = vpop.eup %2996 }
 0x139   :  { %v2999_v8 = vpop.eup %2998  ;;  %v203_v13 = vmul.f32 %v2997_v7, %v171_v33 }
 0x13a   :  { %v204_v11 = vmul.f32 %v2999_v8, %v3202_v26 }
 0x13c   :  { %v3001_v9 = vpop.eup %3000 }
 0x13d   :  { %v205_v10 = vmul.f32 %v3001_v9, %v173_v34 }
 0x171   :  { %v213_v14 = vpop.permute.xlu1 %212  ;;  %v211_v15 = vpop.permute.xlu0 %210 }
 0x172   :  { %v218_v16 = vmul.f32 %v213_v14, %v204_v11  ;;  %v219_v17 = vmul.f32 %v213_v14, %v205_v10  ;;  %v216_v18 = vmul.f32 %v211_v15, %v202_v12  ;;  %v217_v19 = vmul.f32 %v211_v15, %v203_v13 }
 0x174   :  { %v222_v20 = vadd.f32 %v218_v16, %v3232_v54  ;;  %v223_v21 = vadd.f32 %v219_v17, %v3232_v54  ;;  %v220_v22 = vadd.f32 %v216_v18, %v3229_v53  ;;  %v221_v23 = vadd.f32 %v217_v19, %v3229_v53 }
 0x176   :  { %v225_v24 = vpack.c.bf16 %v223_v21, %v222_v20  ;;  %v224_v27 = vpack.c.bf16 %v221_v23, %v220_v22 }
 0x178   :  { %2612 = vmatprep.mubr.msk.bf16.mxu0 %vm90_vm0, %v224_v27 }
 0x179   :  { %2613 = vmatmul.mubr.msk.bf16.vlgmr.msra.gmra.mrb[4].mxu0 %vm90_vm0, %v225_v24 }
 0x24c   :  { %v2614_v26 = vpop.f32.mrb[4].mxu0 }
 0x24d   :  { %v3249_v28 = vadd.f32 %v2614_v26, %v2450_v25  ;;  %v289_v29 = vpop.f32.mrb[5].mxu0 }
 0x24e   :  { %v290_v30 = vadd.f32 %v2450_v25, %v289_v29  ;;  %v2615_v31 = vpop.f32.mrb[6].mxu0 }
 0x24f   :  { %v3251_v32 = vadd.f32 %v2615_v31, %v2450_v25  ;;  %v292_v33 = vpop.f32.mrb[7].mxu0 }
 0x250   :  { %v293_v34 = vadd.f32 %v2450_v25, %v292_v33  ;;  %v3253_v35 = vmul.f32 0.35355338, %v290_v30 }
 0x251   :  { %v3257_v36 = vpack.i.bf16 %v3251_v32, %v3249_v28 }
 0x252   :  { %2620 = vmatprep.mubr.msk.f32.mxu0 %vm314_vm1, %v3253_v35  ;;  %v3261_v37 = vpack.i.bf16 %v293_v34, %v290_v30  ;;  %v3275_v43 = vmul.f32 0.35355338, %v293_v34 }
 0x254   :  { %2861 = vrot.lane.b32.xlu1 %v3261_v37, %s3088_s4 }
 0x2c6   :  { %v2862_v38 = vpop.permute.xlu1 %2861 }
 0x2c7   :  { %v2864_v39 = vunpack.i.h.bf16 %v2862_v38  ;;  %v2863_v40 = vunpack.i.l.bf16 %v2862_v38 }
 0x2c9   :  { %v2764_v42 = vpack.c.bf16 %v2864_v39, %v2863_v40 }
 0x2cb   :  { %2766 = vmatprep.subr.msk.bf16.mxu0 %vm3267_vm2, %v2764_v42 }
 0x2cc   :  { %2769 = vmatpush3.bf16.xpose.msk.msra.mxu0 %vm3267_vm2, %v2764_v42 }
 0x2d3   :  { %2621 = vmatmul.mubr.msk.f32.vlgmr.msra.gmra.mrb[8].mxu0 %vm314_vm1, %v3275_v43 }
 0x3a6   :  { %v2622_v45 = vpop.f32.mrb[8].mxu0 }
 0x3a7   :  { %v391_v46 = vpop.f32.mrb[9].mxu0  ;;  %v404_v47 = vsel %vm400_vm3, %v2622_v45, -inf }
 0x3a8   :  { %405 = vmax.xlane.f32.xlu0 %v404_v47  ;;  %v401_v48 = vsel %vm400_vm3, %v391_v46, -inf }
 0x3a9   :  { %402 = vmax.xlane.f32.xlu1 %v401_v48 }
 0x3ba   :  { %2866 = vrot.lane.b32.xlu1 %v3261_v37, %s3089_s5 }
 0x3be   :  { %510 = vrot.lane.b32.xlu1 %v3253_v35, %s3090_s27 }
 0x3c2   :  { %512 = vrot.lane.b32.xlu1 %v3275_v43, %s3090_s27 }
 0x435   :  { %v406_v50 = vpop.xlane.xlu0 %405 }
 0x436   :  { %v408_v52 = vsub.f32 %v2622_v45, %v406_v50  ;;  %v403_v55 = vpop.xlane.xlu1 %402 }
 0x437   :  { %v407_v56 = vsub.f32 %v391_v46, %v403_v55 }
 0x438   :  { %v411_v57 = vmul.f32 1.442695, %v408_v52 }
 0x439   :  { %v409_v58 = vmul.f32 1.442695, %v407_v56 }
 0x43a   :  { %3002 = vpow2.f32 %v411_v57  ;;  %v2867_v59 = vpop.permute.xlu1 %2866 }
 0x43b   :  { %v2869_v60 = vunpack.i.h.bf16 %v2867_v59  ;;  %v2868_v61 = vunpack.i.l.bf16 %v2867_v59  ;;  %3004 = vpow2.f32 %v409_v58 }
 0x43d   :  { %v2770_v62 = vpack.c.bf16 %v2869_v60, %v2868_v61 }
 0x43e   :  { %v511_v13 = vpop.permute.xlu1 %510 }
 0x43f   :  { %2771 = vmatprep.subr.bf16.mxu0 %v2770_v62 }
 0x440   :  { %2773 = vmatpush3.bf16.msra.mxu0 %v2770_v62 }
 0x442   :  { %v513_v14 = vpop.permute.xlu1 %512 }
 0x444   :  { %v3003_v63 = vpop.eup %3002 }
 0x445   :  { %v416_v0 = vsel %vm400_vm3, %v3003_v63, 0.0  ;;  %v3005_v1 = vpop.eup %3004 }
 0x446   :  { %417 = vadd.xlane.f32.xlu0 %v416_v0  ;;  %v413_v2 = vsel %vm400_vm3, %v3005_v1, 0.0 }
 0x44a   :  { %414 = vadd.xlane.f32.xlu0 %v413_v2 }
 0x460   :  { %2871 = vrot.lane.b32.xlu0 %v3261_v37, %s3091_s28 }
 0x4d3   :  { %v418_v3 = vpop.xlane.xlu0 %417 }
 0x4d4   :  { %3006 = vrcp.f32 %v418_v3 }
 0x4d7   :  { %v415_v4 = vpop.xlane.xlu0 %414 }
 0x4d8   :  { %3008 = vrcp.f32 %v415_v4 }
 0x4db   :  { %v2872_v5 = vpop.permute.xlu0 %2871 }
 0x4dc   :  { %v2874_v6 = vunpack.i.h.bf16 %v2872_v5  ;;  %v2873_v7 = vunpack.i.l.bf16 %v2872_v5 }
 0x4de   :  { %v2774_v8 = vpack.c.bf16 %v2874_v6, %v2873_v7  ;;  %v3007_v9 = vpop.eup %3006 }
 0x4df   :  { %v422_v12 = vmul.f32 %v3007_v9, %v3003_v63 }
 0x4e0   :  { %2776 = vmatprep.subr.msk.bf16.mxu0 %vm3267_vm2, %v2774_v8 }
 0x4e2   :  { %v3009_v10 = vpop.eup %3008 }
 0x4e3   :  { %v421_v11 = vmul.f32 %v3009_v10, %v3005_v1 }
 0x4e5   :  { %2627 = vmatprep.mubr.msk.f32.mxu0 %vm400_vm3, %v421_v11 }
 0x4e6   :  { %2628 = vmatmul.mubr.msk.f32.vlgmr.msra.gmra.mrb[10].mxu0 %vm400_vm3, %v422_v12 }
 0x4e7   :  { %2779 = vmatpush3.bf16.xpose.msk.msra.mxu0 %vm3267_vm2, %v2774_v8  ;;  %2634 = vmatprep.mubr.msk.f32.mxu0 %vm314_vm1, %v511_v13 }
 0x4ee   :  { %2635 = vmatmul.mubr.msk.f32.vlgmr.msra.gmra.mrb[12].mxu0 %vm314_vm1, %v513_v14 }
 0x5b9   :  { %v3299_v15 = vpop.f32.mrb[10].mxu0 }
 0x5ba   :  { %v3301_v16 = vpop.f32.mrb[11].mxu0 }
 0x5c1   :  { %v2636_v17 = vpop.f32.mrb[12].mxu0 }
 0x5c2   :  { %v592_v18 = vpop.f32.mrb[13].mxu0  ;;  %v604_v19 = vsel %vm400_vm3, %v2636_v17, -inf }
 0x5c3   :  { %605 = vmax.xlane.f32.xlu0 %v604_v19  ;;  %v601_v20 = vsel %vm400_vm3, %v592_v18, -inf }
 0x5c4   :  { %602 = vmax.xlane.f32.xlu1 %v601_v20 }
 0x5d5   :  { %2876 = vrot.lane.b32.xlu1 %v3261_v37, %s3092_s29 }
 0x5d9   :  { %710 = vrot.lane.b32.xlu1 %v3253_v35, %s3093_s30 }
 0x5dd   :  { %712 = vrot.lane.b32.xlu1 %v3275_v43, %s3093_s30 }
 0x650   :  { %v606_v21 = vpop.xlane.xlu0 %605 }
 0x651   :  { %v608_v22 = vsub.f32 %v2636_v17, %v606_v21  ;;  %v603_v23 = vpop.xlane.xlu1 %602 }
 0x652   :  { %v607_v24 = vsub.f32 %v592_v18, %v603_v23 }
 0x653   :  { %v611_v27 = vmul.f32 1.442695, %v608_v22 }
 0x654   :  { %v609_v25 = vmul.f32 1.442695, %v607_v24 }
 0x655   :  { %3010 = vpow2.f32 %v611_v27  ;;  %v2877_v26 = vpop.permute.xlu1 %2876 }
 0x656   :  { %v2879_v29 = vunpack.i.h.bf16 %v2877_v26  ;;  %v2878_v30 = vunpack.i.l.bf16 %v2877_v26  ;;  %3012 = vpow2.f32 %v609_v25 }
 0x658   :  { %v2780_v31 = vpack.c.bf16 %v2879_v29, %v2878_v30 }
 0x659   :  { %v711_v57 = vpop.permute.xlu1 %710 }
 0x65a   :  { %2781 = vmatprep.subr.bf16.mxu1 %v2780_v31 }
 0x65b   :  { %2783 = vmatpush3.bf16.msra.mxu1 %v2780_v31 }
 0x65d   :  { %v713_v58 = vpop.permute.xlu1 %712 }
 0x65f   :  { %v3011_v33 = vpop.eup %3010 }
 0x660   :  { %v616_v34 = vsel %vm400_vm3, %v3011_v33, 0.0  ;;  %v3013_v38 = vpop.eup %3012 }
 0x661   :  { %617 = vadd.xlane.f32.xlu0 %v616_v34  ;;  %v613_v39 = vsel %vm400_vm3, %v3013_v38, 0.0 }
 0x665   :  { %614 = vadd.xlane.f32.xlu0 %v613_v39 }
 0x67b   :  { %2881 = vrot.lane.b32.xlu0 %v3261_v37, %s3094_s13 }
 0x6ee   :  { %v618_v40 = vpop.xlane.xlu0 %617 }
 0x6ef   :  { %3014 = vrcp.f32 %v618_v40 }
 0x6f2   :  { %v615_v42 = vpop.xlane.xlu0 %614 }
 0x6f3   :  { %3016 = vrcp.f32 %v615_v42 }
 0x6f6   :  { %v2882_v45 = vpop.permute.xlu0 %2881 }
 0x6f7   :  { %v2884_v46 = vunpack.i.h.bf16 %v2882_v45  ;;  %v2883_v47 = vunpack.i.l.bf16 %v2882_v45 }
 0x6f9   :  { %v2784_v48 = vpack.c.bf16 %v2884_v46, %v2883_v47  ;;  %v3015_v50 = vpop.eup %3014 }
 0x6fa   :  { %v622_v56 = vmul.f32 %v3015_v50, %v3011_v33 }
 0x6fb   :  { %2786 = vmatprep.subr.msk.bf16.mxu1 %vm3267_vm2, %v2784_v48 }
 0x6fd   :  { %v3017_v52 = vpop.eup %3016 }
 0x6fe   :  { %v621_v55 = vmul.f32 %v3017_v52, %v3013_v38 }
 0x700   :  { %2641 = vmatprep.mubr.msk.f32.mxu1 %vm400_vm3, %v621_v55 }
 0x701   :  { %2642 = vmatmul.mubr.msk.f32.vlgmr.msra.gmra.mrb[0].mxu1 %vm400_vm3, %v622_v56 }
 0x702   :  { %2789 = vmatpush3.bf16.xpose.msk.msra.mxu1 %vm3267_vm2, %v2784_v48  ;;  %2648 = vmatprep.mubr.msk.f32.mxu1 %vm314_vm1, %v711_v57 }
 0x709   :  { %2649 = vmatmul.mubr.msk.f32.vlgmr.msra.gmra.mrb[2].mxu1 %vm314_vm1, %v713_v58 }
 0x7d4   :  { %v3323_v59 = vpop.f32.mrb[0].mxu1 }
 0x7d5   :  { %v3325_v60 = vpop.f32.mrb[1].mxu1 }
 0x7d6   :  { %v2940_v61 = vpack.i.bf16 %v3323_v59, %v3325_v60 }
 0x7dc   :  { %v2650_v62 = vpop.f32.mrb[2].mxu1 }
 0x7dd   :  { %v792_v63 = vpop.f32.mrb[3].mxu1  ;;  %v804_v0 = vsel %vm400_vm3, %v2650_v62, -inf }
 0x7de   :  { %805 = vmax.xlane.f32.xlu0 %v804_v0  ;;  %v801_v1 = vsel %vm400_vm3, %v792_v63, -inf }
 0x7df   :  { %802 = vmax.xlane.f32.xlu1 %v801_v1 }
 0x7f0   :  { %2886 = vrot.lane.b32.xlu1 %v3261_v37, %s3095_s14 }
 0x7f4   :  { %910 = vrot.lane.b32.xlu1 %v3253_v35, %s3096_s15 }
 0x7f8   :  { %912 = vrot.lane.b32.xlu1 %v3275_v43, %s3096_s15 }
 0x86b   :  { %v806_v2 = vpop.xlane.xlu0 %805 }
 0x86c   :  { %v808_v3 = vsub.f32 %v2650_v62, %v806_v2  ;;  %v803_v4 = vpop.xlane.xlu1 %802 }
 0x86d   :  { %v807_v5 = vsub.f32 %v792_v63, %v803_v4 }
 0x86e   :  { %v811_v6 = vmul.f32 1.442695, %v808_v3 }
 0x86f   :  { %v809_v7 = vmul.f32 1.442695, %v807_v5 }
 0x870   :  { %3018 = vpow2.f32 %v811_v6  ;;  %v2887_v8 = vpop.permute.xlu1 %2886 }
 0x871   :  { %v2889_v9 = vunpack.i.h.bf16 %v2887_v8  ;;  %v2888_v10 = vunpack.i.l.bf16 %v2887_v8  ;;  %3020 = vpow2.f32 %v809_v7 }
 0x873   :  { %v2790_v11 = vpack.c.bf16 %v2889_v9, %v2888_v10  ;;  %v3367_v9 = vmul.f32 0.35355338, %v3249_v28  ;;  %v3375_v10 = vmul.f32 0.35355338, %v3251_v32 }
 0x874   :  { %v911_v25 = vpop.permute.xlu1 %910 }
 0x875   :  { %2791 = vmatprep.subr.bf16.mxu0 %v2790_v11 }
 0x876   :  { %2793 = vmatpush3.bf16.msra.mxu0 %v2790_v11 }
 0x878   :  { %v913_v26 = vpop.permute.xlu1 %912 }
 0x87a   :  { %v3019_v12 = vpop.eup %3018 }
 0x87b   :  { %v816_v35 = vsel %vm400_vm3, %v3019_v12, 0.0  ;;  %v3021_v13 = vpop.eup %3020 }
 0x87c   :  { %817 = vadd.xlane.f32.xlu0 %v816_v35  ;;  %v813_v43 = vsel %vm400_vm3, %v3021_v13, 0.0 }
 0x880   :  { %814 = vadd.xlane.f32.xlu0 %v813_v43 }
 0x896   :  { %2891 = vrot.lane.b32.xlu0 %v3261_v37, %s3097_s16 }
 0x909   :  { %v818_v14 = vpop.xlane.xlu0 %817 }
 0x90a   :  { %3022 = vrcp.f32 %v818_v14 }
 0x90d   :  { %v815_v17 = vpop.xlane.xlu0 %814 }
 0x90e   :  { %3024 = vrcp.f32 %v815_v17 }
 0x911   :  { %v2892_v18 = vpop.permute.xlu0 %2891 }
 0x912   :  { %v2894_v19 = vunpack.i.h.bf16 %v2892_v18  ;;  %v2893_v20 = vunpack.i.l.bf16 %v2892_v18 }
 0x914   :  { %v2794_v21 = vpack.c.bf16 %v2894_v19, %v2893_v20  ;;  %v3023_v22 = vpop.eup %3022 }
 0x915   :  { %v822_v27 = vmul.f32 %v3023_v22, %v3019_v12 }
 0x916   :  { %2796 = vmatprep.subr.msk.bf16.mxu0 %vm3267_vm2, %v2794_v21 }
 0x918   :  { %v3025_v23 = vpop.eup %3024 }
 0x919   :  { %v821_v24 = vmul.f32 %v3025_v23, %v3021_v13 }
 0x91b   :  { %2655 = vmatprep.mubr.msk.f32.mxu0 %vm400_vm3, %v821_v24 }
 0x91c   :  { %2656 = vmatmul.mubr.msk.f32.vlgmr.msra.gmra.mrb[14].mxu0 %vm400_vm3, %v822_v27 }
 0x91d   :  { %2799 = vmatpush3.bf16.xpose.msk.msra.mxu0 %vm3267_vm2, %v2794_v21  ;;  %2662 = vmatprep.mubr.msk.f32.mxu0 %vm314_vm1, %v911_v25 }
 0x924   :  { %2663 = vmatmul.mubr.msk.f32.vlgmr.msra.gmra.mrb[16].mxu0 %vm314_vm1, %v913_v26 }
 0x9ef   :  { %v3349_v29 = vpop.f32.mrb[14].mxu0 }
 0x9f0   :  { %v3351_v30 = vpop.f32.mrb[15].mxu0 }
 0x9f1   :  { %v2945_v31 = vpack.i.bf16 %v3349_v29, %v3351_v30 }
 0x9f7   :  { %v2664_v33 = vpop.f32.mrb[16].mxu0 }
 0x9f8   :  { %v992_v34 = vpop.f32.mrb[17].mxu0  ;;  %v1004_v38 = vsel %vm400_vm3, %v2664_v33, -inf }
 0x9f9   :  { %1005 = vmax.xlane.f32.xlu0 %v1004_v38  ;;  %v1001_v39 = vsel %vm400_vm3, %v992_v34, -inf }
 0x9fa   :  { %1002 = vmax.xlane.f32.xlu1 %v1001_v39 }
 0xa0b   :  { %2896 = vrot.lane.b32.xlu1 %v3261_v37, %s3098_s17 }
 0xa86   :  { %v1006_v40 = vpop.xlane.xlu0 %1005 }
 0xa87   :  { %v1008_v42 = vsub.f32 %v2664_v33, %v1006_v40  ;;  %v1003_v45 = vpop.xlane.xlu1 %1002 }
 0xa88   :  { %v1007_v46 = vsub.f32 %v992_v34, %v1003_v45 }
 0xa89   :  { %v1011_v47 = vmul.f32 1.442695, %v1008_v42 }
 0xa8a   :  { %v1009_v48 = vmul.f32 1.442695, %v1007_v46 }
 0xa8b   :  { %3026 = vpow2.f32 %v1011_v47  ;;  %v2897_v50 = vpop.permute.xlu1 %2896 }
 0xa8c   :  { %v2899_v52 = vunpack.i.h.bf16 %v2897_v50  ;;  %v2898_v55 = vunpack.i.l.bf16 %v2897_v50  ;;  %3028 = vpow2.f32 %v1009_v48 }
 0xa8e   :  { %v2800_v56 = vpack.c.bf16 %v2899_v52, %v2898_v55 }
 0xa90   :  { %2801 = vmatprep.subr.bf16.mxu1 %v2800_v56 }
 0xa91   :  { %2803 = vmatpush3.bf16.msra.mxu1 %v2800_v56 }
 0xa95   :  { %v3027_v57 = vpop.eup %3026 }
 0xa96   :  { %v1016_v58 = vsel %vm400_vm3, %v3027_v57, 0.0  ;;  %v3029_v62 = vpop.eup %3028 }
 0xa97   :  { %1017 = vadd.xlane.f32.xlu0 %v1016_v58  ;;  %v1013_v37 = vsel %vm400_vm3, %v3029_v62, 0.0 }
 0xa9b   :  { %1014 = vadd.xlane.f32.xlu0 %v1013_v37 }
 0xab1   :  { %2901 = vrot.lane.b32.xlu0 %v3257_v36, %s3088_s4 }
 0xb24   :  { %v1018_v63 = vpop.xlane.xlu0 %1017 }
 0xb25   :  { %3030 = vrcp.f32 %v1018_v63 }
 0xb28   :  { %v1015_v0 = vpop.xlane.xlu0 %1014 }
 0xb29   :  { %3032 = vrcp.f32 %v1015_v0 }
 0xb2c   :  { %v2902_v1 = vpop.permute.xlu0 %2901 }
 0xb2d   :  { %v2904_v2 = vunpack.i.h.bf16 %v2902_v1  ;;  %v2903_v3 = vunpack.i.l.bf16 %v2902_v1 }
 0xb2f   :  { %v2804_v4 = vpack.c.bf16 %v2904_v2, %v2903_v3  ;;  %v3031_v5 = vpop.eup %3030 }
 0xb30   :  { %v1022_v8 = vmul.f32 %v3031_v5, %v3027_v57 }
 0xb31   :  { %2806 = vmatprep.subr.msk.bf16.mxu1 %vm3267_vm2, %v2804_v4 }
 0xb33   :  { %v3033_v6 = vpop.eup %3032 }
 0xb34   :  { %v1021_v7 = vmul.f32 %v3033_v6, %v3029_v62 }
 0xb36   :  { %2669 = vmatprep.mubr.msk.f32.mxu1 %vm400_vm3, %v1021_v7 }
 0xb37   :  { %2670 = vmatmul.mubr.msk.f32.vlgmr.msra.gmra.mrb[4].mxu1 %vm400_vm3, %v1022_v8 }
 0xb38   :  { %2809 = vmatpush3.bf16.xpose.msk.msra.mxu1 %vm3267_vm2, %v2804_v4  ;;  %2676 = vmatprep.mubr.msk.f32.mxu1 %vm314_vm1, %v3367_v9 }
 0xb3f   :  { %2677 = vmatmul.mubr.msk.f32.vlgmr.msra.gmra.mrb[6].mxu1 %vm314_vm1, %v3375_v10 }
 0xc0a   :  { %v3379_v11 = vpop.f32.mrb[4].mxu1 }
 0xc0b   :  { %v3381_v12 = vpop.f32.mrb[5].mxu1 }
 0xc0c   :  { %v2955_v28 = vpack.i.bf16 %v3379_v11, %v3381_v12 }
 0xc12   :  { %v2678_v35 = vpop.f32.mrb[6].mxu1 }
 0xc13   :  { %v1223_v13 = vpop.f32.mrb[7].mxu1  ;;  %v1235_v43 = vsel %vm400_vm3, %v2678_v35, -inf }
 0xc14   :  { %1236 = vmax.xlane.f32.xlu0 %v1235_v43  ;;  %v1232_v14 = vsel %vm400_vm3, %v1223_v13, -inf }
 0xc15   :  { %1233 = vmax.xlane.f32.xlu1 %v1232_v14 }
 0xc26   :  { %2906 = vrot.lane.b32.xlu1 %v3257_v36, %s3089_s5 }
 0xc2a   :  { %1341 = vrot.lane.b32.xlu1 %v3367_v9, %s3090_s27 }
 0xca1   :  { %v1237_v32 = vpop.xlane.xlu0 %1236 }
 0xca2   :  { %v1239_v17 = vsub.f32 %v2678_v35, %v1237_v32  ;;  %v1234_v18 = vpop.xlane.xlu1 %1233 }
 0xca3   :  { %v1238_v19 = vsub.f32 %v1223_v13, %v1234_v18 }
 0xca4   :  { %v1242_v20 = vmul.f32 1.442695, %v1239_v17 }
 0xca5   :  { %v1240_v21 = vmul.f32 1.442695, %v1238_v19 }
 0xca6   :  { %3034 = vpow2.f32 %v1242_v20  ;;  %v2907_v22 = vpop.permute.xlu1 %2906 }
 0xca7   :  { %3036 = vpow2.f32 %v1240_v21  ;;  %v2909_v23 = vunpack.i.h.bf16 %v2907_v22  ;;  %v2908_v24 = vunpack.i.l.bf16 %v2907_v22 }
 0xca9   :  { %v2810_v27 = vpack.c.bf16 %v2909_v23, %v2908_v24 }
 0xcaa   :  { %v1342_v38 = vpop.permute.xlu1 %1341 }
 0xcab   :  { %2811 = vmatprep.subr.bf16.mxu0 %v2810_v27 }
 0xcac   :  { %2813 = vmatpush3.bf16.msra.mxu0 %v2810_v27 }
 0xcb0   :  { %v3035_v25 = vpop.eup %3034 }
 0xcb1   :  { %v3037_v26 = vpop.eup %3036  ;;  %v1247_v33 = vsel %vm400_vm3, %v3035_v25, 0.0 }
 0xcb2   :  { %1248 = vadd.xlane.f32.xlu0 %v1247_v33  ;;  %v1244_v34 = vsel %vm400_vm3, %v3037_v26, 0.0 }
 0xcb3   :  { %1245 = vadd.xlane.f32.xlu1 %v1244_v34 }
 0xcc4   :  { %1343 = vrot.lane.b32.xlu1 %v3375_v10, %s3090_s27 }
 0xcc8   :  { %2911 = vrot.lane.b32.xlu0 %v3257_v36, %s3091_s28 }
 0xd3f   :  { %v1249_v39 = vpop.xlane.xlu0 %1248 }
 0xd40   :  { %3038 = vrcp.f32 %v1249_v39  ;;  %v1246_v40 = vpop.xlane.xlu1 %1245 }
 0xd41   :  { %3040 = vrcp.f32 %v1246_v40 }
 0xd43   :  { %v2912_v42 = vpop.permute.xlu0 %2911 }
 0xd44   :  { %v2914_v45 = vunpack.i.h.bf16 %v2912_v42  ;;  %v2913_v46 = vunpack.i.l.bf16 %v2912_v42  ;;  %v1344_v56 = vpop.permute.xlu1 %1343 }
 0xd46   :  { %v2814_v47 = vpack.c.bf16 %v2914_v45, %v2913_v46 }
 0xd48   :  { %2816 = vmatprep.subr.msk.bf16.mxu0 %vm3267_vm2, %v2814_v47 }
 0xd4a   :  { %v3039_v48 = vpop.eup %3038 }
 0xd4b   :  { %v3041_v50 = vpop.eup %3040  ;;  %v1253_v55 = vmul.f32 %v3039_v48, %v3035_v25 }
 0xd4c   :  { %v1252_v52 = vmul.f32 %v3041_v50, %v3037_v26 }
 0xd4e   :  { %2683 = vmatprep.mubr.msk.f32.mxu0 %vm400_vm3, %v1252_v52 }
 0xd4f   :  { %2684 = vmatmul.mubr.msk.f32.vlgmr.msra.gmra.mrb[18].mxu0 %vm400_vm3, %v1253_v55 }
 0xd50   :  { %2819 = vmatpush3.bf16.xpose.msk.msra.mxu0 %vm3267_vm2, %v2814_v47  ;;  %2690 = vmatprep.mubr.msk.f32.mxu0 %vm314_vm1, %v1342_v38 }
 0xd57   :  { %2691 = vmatmul.mubr.msk.f32.vlgmr.msra.gmra.mrb[20].mxu0 %vm314_vm1, %v1344_v56 }
 0xe22   :  { %v3405_v57 = vpop.f32.mrb[18].mxu0 }
 0xe23   :  { %v3407_v58 = vpop.f32.mrb[19].mxu0 }
 0xe2a   :  { %v2692_v62 = vpop.f32.mrb[20].mxu0 }
 0xe2b   :  { %v1423_v37 = vpop.f32.mrb[21].mxu0  ;;  %v1435_v63 = vsel %vm400_vm3, %v2692_v62, -inf }
 0xe2c   :  { %1436 = vmax.xlane.f32.xlu0 %v1435_v63  ;;  %v1432_v0 = vsel %vm400_vm3, %v1423_v37, -inf }
 0xe2d   :  { %1433 = vmax.xlane.f32.xlu1 %v1432_v0 }
 0xe3e   :  { %2916 = vrot.lane.b32.xlu1 %v3257_v36, %s3092_s29 }
 0xe42   :  { %1541 = vrot.lane.b32.xlu1 %v3367_v9, %s3093_s30 }
 0xe46   :  { %1543 = vrot.lane.b32.xlu1 %v3375_v10, %s3093_s30 }
 0xeb9   :  { %v1437_v1 = vpop.xlane.xlu0 %1436 }
 0xeba   :  { %v1439_v2 = vsub.f32 %v2692_v62, %v1437_v1  ;;  %v1434_v3 = vpop.xlane.xlu1 %1433 }
 0xebb   :  { %v1438_v4 = vsub.f32 %v1423_v37, %v1434_v3 }
 0xebc   :  { %v1442_v5 = vmul.f32 1.442695, %v1439_v2 }
 0xebd   :  { %v1440_v6 = vmul.f32 1.442695, %v1438_v4 }
 0xebe   :  { %3042 = vpow2.f32 %v1442_v5  ;;  %v2917_v7 = vpop.permute.xlu1 %2916 }
 0xebf   :  { %v2919_v8 = vunpack.i.h.bf16 %v2917_v7  ;;  %v2918_v35 = vunpack.i.l.bf16 %v2917_v7  ;;  %3044 = vpow2.f32 %v1440_v6 }
 0xec1   :  { %v2820_v13 = vpack.c.bf16 %v2919_v8, %v2918_v35 }
 0xec2   :  { %v1542_v33 = vpop.permute.xlu1 %1541 }
 0xec3   :  { %2821 = vmatprep.subr.bf16.mxu1 %v2820_v13 }
 0xec4   :  { %2823 = vmatpush3.bf16.msra.mxu1 %v2820_v13 }
 0xec6   :  { %v1544_v34 = vpop.permute.xlu1 %1543 }
 0xec8   :  { %v3043_v43 = vpop.eup %3042 }
 0xec9   :  { %v1447_v14 = vsel %vm400_vm3, %v3043_v43, 0.0  ;;  %v3045_v32 = vpop.eup %3044 }
 0xeca   :  { %1448 = vadd.xlane.f32.xlu0 %v1447_v14  ;;  %v1444_v17 = vsel %vm400_vm3, %v3045_v32, 0.0 }
 0xece   :  { %1445 = vadd.xlane.f32.xlu0 %v1444_v17 }
 0xee4   :  { %2921 = vrot.lane.b32.xlu0 %v3257_v36, %s3094_s13 }
 0xf57   :  { %v1449_v18 = vpop.xlane.xlu0 %1448 }
 0xf58   :  { %3046 = vrcp.f32 %v1449_v18 }
 0xf5b   :  { %v1446_v19 = vpop.xlane.xlu0 %1445 }
 0xf5c   :  { %3048 = vrcp.f32 %v1446_v19 }
 0xf5f   :  { %v2922_v20 = vpop.permute.xlu0 %2921 }
 0xf60   :  { %v2924_v21 = vunpack.i.h.bf16 %v2922_v20  ;;  %v2923_v22 = vunpack.i.l.bf16 %v2922_v20 }
 0xf62   :  { %v2824_v23 = vpack.c.bf16 %v2924_v21, %v2923_v22  ;;  %v3047_v24 = vpop.eup %3046 }
 0xf63   :  { %v1453_v26 = vmul.f32 %v3047_v24, %v3043_v43 }
 0xf64   :  { %2826 = vmatprep.subr.msk.bf16.mxu1 %vm3267_vm2, %v2824_v23 }
 0xf66   :  { %v3049_v27 = vpop.eup %3048 }
 0xf67   :  { %v1452_v25 = vmul.f32 %v3049_v27, %v3045_v32 }
 0xf69   :  { %2697 = vmatprep.mubr.msk.f32.mxu1 %vm400_vm3, %v1452_v25 }
 0xf6a   :  { %2698 = vmatmul.mubr.msk.f32.vlgmr.msra.gmra.mrb[8].mxu1 %vm400_vm3, %v1453_v26 }
 0xf6b   :  { %2829 = vmatpush3.bf16.xpose.msk.msra.mxu1 %vm3267_vm2, %v2824_v23  ;;  %2704 = vmatprep.mubr.msk.f32.mxu1 %vm314_vm1, %v1542_v33 }
 0xf72   :  { %2705 = vmatmul.mubr.msk.f32.vlgmr.msra.gmra.mrb[10].mxu1 %vm314_vm1, %v1544_v34 }
0x103d   :  { %v3429_v38 = vpop.f32.mrb[8].mxu1 }
0x103e   :  { %v3431_v39 = vpop.f32.mrb[9].mxu1 }
0x103f   :  { %v2950_v40 = vpack.i.bf16 %v3429_v38, %v3431_v39 }
0x1045   :  { %v2706_v42 = vpop.f32.mrb[10].mxu1 }
0x1046   :  { %v1623_v45 = vpop.f32.mrb[11].mxu1  ;;  %v1635_v46 = vsel %vm400_vm3, %v2706_v42, -inf }
0x1047   :  { %1636 = vmax.xlane.f32.xlu0 %v1635_v46  ;;  %v1632_v47 = vsel %vm400_vm3, %v1623_v45, -inf }
0x1048   :  { %1633 = vmax.xlane.f32.xlu1 %v1632_v47 }
0x1059   :  { %2926 = vrot.lane.b32.xlu1 %v3257_v36, %s3095_s14 }
0x105d   :  { %1741 = vrot.lane.b32.xlu1 %v3367_v9, %s3096_s15 }
0x1061   :  { %1743 = vrot.lane.b32.xlu1 %v3375_v10, %s3096_s15 }
0x10d4   :  { %v1637_v48 = vpop.xlane.xlu0 %1636 }
0x10d5   :  { %v1639_v50 = vsub.f32 %v2706_v42, %v1637_v48  ;;  %v1634_v52 = vpop.xlane.xlu1 %1633 }
0x10d6   :  { %v1638_v55 = vsub.f32 %v1623_v45, %v1634_v52 }
0x10d7   :  { %v1642_v56 = vmul.f32 1.442695, %v1639_v50 }
0x10d8   :  { %v1640_v62 = vmul.f32 1.442695, %v1638_v55 }
0x10d9   :  { %3050 = vpow2.f32 %v1642_v56  ;;  %v2927_v37 = vpop.permute.xlu1 %2926 }
0x10da   :  { %v2929_v63 = vunpack.i.h.bf16 %v2927_v37  ;;  %v2928_v0 = vunpack.i.l.bf16 %v2927_v37  ;;  %3052 = vpow2.f32 %v1640_v62 }
0x10dc   :  { %v2830_v1 = vpack.c.bf16 %v2929_v63, %v2928_v0 }
0x10dd   :  { %v1742_v17 = vpop.permute.xlu1 %1741 }
0x10de   :  { %2831 = vmatprep.subr.bf16.mxu0 %v2830_v1 }
0x10df   :  { %2833 = vmatpush3.bf16.msra.mxu0 %v2830_v1 }
0x10e1   :  { %v1744_v18 = vpop.permute.xlu1 %1743 }
0x10e3   :  { %v3051_v2 = vpop.eup %3050 }
0x10e4   :  { %v1647_v9 = vsel %vm400_vm3, %v3051_v2, 0.0  ;;  %v3053_v3 = vpop.eup %3052 }
0x10e5   :  { %1648 = vadd.xlane.f32.xlu0 %v1647_v9  ;;  %v1644_v10 = vsel %vm400_vm3, %v3053_v3, 0.0 }
0x10e9   :  { %1645 = vadd.xlane.f32.xlu0 %v1644_v10 }
0x10ff   :  { %2931 = vrot.lane.b32.xlu0 %v3257_v36, %s3097_s16 }
0x1172   :  { %v1649_v4 = vpop.xlane.xlu0 %1648 }
0x1173   :  { %3054 = vrcp.f32 %v1649_v4 }
0x1176   :  { %v1646_v5 = vpop.xlane.xlu0 %1645 }
0x1177   :  { %3056 = vrcp.f32 %v1646_v5 }
0x117a   :  { %v2932_v6 = vpop.permute.xlu0 %2931 }
0x117b   :  { %v2934_v7 = vunpack.i.h.bf16 %v2932_v6  ;;  %v2933_v8 = vunpack.i.l.bf16 %v2932_v6 }
0x117d   :  { %v2834_v35 = vpack.c.bf16 %v2934_v7, %v2933_v8  ;;  %v3055_v13 = vpop.eup %3054 }
0x117e   :  { %v1653_v32 = vmul.f32 %v3055_v13, %v3051_v2 }
0x117f   :  { %2836 = vmatprep.subr.msk.bf16.mxu0 %vm3267_vm2, %v2834_v35 }
0x1181   :  { %v3057_v43 = vpop.eup %3056 }
0x1182   :  { %v1652_v14 = vmul.f32 %v3057_v43, %v3053_v3 }
0x1184   :  { %2711 = vmatprep.mubr.msk.f32.mxu0 %vm400_vm3, %v1652_v14 }
0x1185   :  { %2712 = vmatmul.mubr.msk.f32.vlgmr.msra.gmra.mrb[22].mxu0 %vm400_vm3, %v1653_v32 }
0x1186   :  { %2839 = vmatpush3.bf16.xpose.msk.msra.mxu0 %vm3267_vm2, %v2834_v35  ;;  %2718 = vmatprep.mubr.msk.f32.mxu0 %vm314_vm1, %v1742_v17 }
0x118d   :  { %2719 = vmatmul.mubr.msk.f32.vlgmr.msra.gmra.mrb[24].mxu0 %vm314_vm1, %v1744_v18 }
0x1258   :  { %v2713_v19 = vpop.f32.mrb[22].mxu0 }
0x1259   :  { %v1732_v20 = vpop.f32.mrb[23].mxu0 }
0x125a   :  { %v2960_v21 = vpack.i.bf16 %v2713_v19, %v1732_v20 }
0x1260   :  { %v2720_v22 = vpop.f32.mrb[24].mxu0 }
0x1261   :  { %v1823_v23 = vpop.f32.mrb[25].mxu0  ;;  %v1835_v24 = vsel %vm400_vm3, %v2720_v22, -inf }
0x1262   :  { %1836 = vmax.xlane.f32.xlu0 %v1835_v24  ;;  %v1832_v27 = vsel %vm400_vm3, %v1823_v23, -inf  ;;  %v2503_v24 = vld [vmem:[%s3648_s7] ss:$0 sm:$0xff] }
0x1263   :  { %1833 = vmax.xlane.f32.xlu1 %v1832_v27 }
0x1274   :  { %2936 = vrot.lane.b32.xlu1 %v3257_v36, %s3098_s17 }
0x1278   :  { %2946 = vrot.lane.b32.xlu1 %v2945_v31, %s3099_s18 }
0x127c   :  { %2951 = vrot.lane.b32.xlu1 %v2950_v40, %s3100_s19 }
0x1280   :  { %2956 = vrot.lane.b32.xlu1 %v2955_v28, %s3101_s20 }
0x12ef   :  { %v1837_v41 = vpop.xlane.xlu0 %1836 }
0x12f0   :  { %v1839_v25 = vsub.f32 %v2720_v22, %v1837_v41  ;;  %v1834_v36 = vpop.xlane.xlu1 %1833 }
0x12f1   :  { %v1838_v26 = vsub.f32 %v1823_v23, %v1834_v36 }
0x12f2   :  { %v1842_v33 = vmul.f32 1.442695, %v1839_v25 }
0x12f3   :  { %v1840_v34 = vmul.f32 1.442695, %v1838_v26 }
0x12f4   :  { %v2937_v42 = vpop.permute.xlu1 %2936 }
0x12f5   :  { %3058 = vpow2.f32 %v1840_v34  ;;  %v2939_v29 = vunpack.i.h.bf16 %v2937_v42  ;;  %v2938_v30 = vunpack.i.l.bf16 %v2937_v42 }
0x12f6   :  { %3060 = vpow2.f32 %v1842_v33 }
0x12f7   :  { %v2840_v31 = vpack.c.bf16 %v2939_v29, %v2938_v30 }
0x12f8   :  { %v2947_v38 = vpop.permute.xlu1 %2946 }
0x12f9   :  { %2841 = vmatprep.subr.bf16.mxu1 %v2840_v31  ;;  %v2949_v62 = vunpack.i.h.bf16 %v2947_v38  ;;  %v2948_v37 = vunpack.i.l.bf16 %v2947_v38 }
0x12fa   :  { %2843 = vmatpush3.bf16.msra.mxu1 %v2840_v31 }
0x12fc   :  { %v2952_v39 = vpop.permute.xlu1 %2951 }
0x12fd   :  { %v2954_v40 = vunpack.i.h.bf16 %v2952_v39  ;;  %v2953_v45 = vunpack.i.l.bf16 %v2952_v39 }
0x12ff   :  { %v3059_v11 = vpop.eup %3058  ;;  %v1966_v12 = vsel %vm314_vm1, %v3405_v57, %v2954_v40  ;;  %v1965_v28 = vsel %vm314_vm1, %v3407_v58, %v2953_v45 }
0x1300   :  { %v1844_v46 = vsel %vm400_vm3, %v3059_v11, 0.0  ;;  %v3061_v47 = vpop.eup %3060  ;;  %v2957_v57 = vpop.permute.xlu1 %2956 }
0x1301   :  { %1845 = vadd.xlane.f32.xlu0 %v1844_v46  ;;  %v1847_v48 = vsel %vm400_vm3, %v3061_v47, 0.0  ;;  %v2959_v0 = vunpack.i.h.bf16 %v2957_v57  ;;  %v2958_v1 = vunpack.i.l.bf16 %v2957_v57 }
0x1305   :  { %1848 = vadd.xlane.f32.xlu0 %v1847_v48  ;;  %v3083_v48 = vld [vmem:[%s3641_s0 + $0x8] sm:$0xff] }
0x131b   :  { %2941 = vrot.lane.b32.xlu0 %v2940_v61, %s3100_s19 }
0x131f   :  { %2961 = vrot.lane.b32.xlu0 %v2960_v21, %s3099_s18 }
0x138e   :  { %v1846_v50 = vpop.xlane.xlu0 %1845 }
0x138f   :  { %3062 = vrcp.f32 %v1846_v50 }
0x1392   :  { %v1849_v52 = vpop.xlane.xlu0 %1848 }
0x1393   :  { %3064 = vrcp.f32 %v1849_v52 }
0x1396   :  { %v2942_v55 = vpop.permute.xlu0 %2941 }
0x1397   :  { %v2944_v58 = vunpack.i.h.bf16 %v2942_v55  ;;  %v2943_v56 = vunpack.i.l.bf16 %v2942_v55  ;;  %v3084_v55 = vld [vmem:[%s3641_s0 + $0x10] sm:$0xff] }
0x1399   :  { %v3063_v63 = vpop.eup %3062  ;;  %v1135_v59 = vsel %vm314_vm1, %v3299_v15, %v2944_v58  ;;  %v1134_v60 = vsel %vm314_vm1, %v3301_v16, %v2943_v56  ;;  %v2978_v15 = vld [vmem:[%s3647_s6] sm:$0xff]   ;;  %v2979_v16 = vld [vmem:[%s3647_s6 + $0x8] sm:$0xff]  }
0x139a   :  { %v1136_v61 = vsel %vm400_vm3, %v1134_v60, %v2948_v37  ;;  %v1137_v2 = vsel %vm400_vm3, %v1135_v59, %v2949_v62  ;;  %v1852_v9 = vmul.f32 %v3063_v63, %v3059_v11  ;;  %2728 = vmatprep.subr.bf16.mxu1 %v2978_v15  ;;  %v2962_v13 = vpop.permute.xlu0 %2961  ;;  %v3085_v37 = vld [vmem:[%s3641_s0 + $0x18] sm:$0xff] }
0x139b   :  { %v1139_v3 = vsel %vm1138_vm4, %v1136_v61, %v2958_v1  ;;  %v1140_v10 = vsel %vm1138_vm4, %v1137_v2, %v2959_v0  ;;  %v2964_v43 = vunpack.i.h.bf16 %v2962_v13  ;;  %v2963_v14 = vunpack.i.l.bf16 %v2962_v13 }
0x139c   :  { %2725 = vmatprep.mubr.msk.f32.mxu1 %vm400_vm3, %v1852_v9  ;;  %v1971_v4 = vpack.c.bf16 %v1140_v10, %v1139_v3 }
0x139d   :  { %v3065_v5 = vpop.eup %3064  ;;  %v1967_v19 = vsel %vm400_vm3, %v1965_v28, %v2963_v14  ;;  %v1968_v20 = vsel %vm400_vm3, %v1966_v12, %v2964_v43  ;;  %v3082_v28 = vld [vmem:[%s3641_s0] sm:$0xff]  ;;  %s3102_s0 = smov 32  }
0x139e   :  { %v1853_v6 = vmul.f32 %v3065_v5, %v3061_v47 }
0x13a0   :  { %2726 = vmatmul.mubr.msk.f32.vlgmr.msra.gmra.mrb[12].mxu1 %vm400_vm3, %v1853_v6 }
0x13a1   :  { %2732 = vmatprep.mubr.msk.bf16.mxu1 %vm90_vm0, %v1971_v4  ;;  %2729 = vmatpush3.bf16.msra.mxu1 %v2978_v15 }
0x13a2   :  { %2730 = vmatprep.subr.bf16.mxu1 %v2979_v16 }
0x13a5   :  { %2731 = vmatpush3.bf16.msra.mxu1 %v2979_v16 }
0x1473   :  { %v2727_v7 = vpop.f32.mrb[12].mxu1 }
0x1474   :  { %v1932_v8 = vpop.f32.mrb[13].mxu1 }
0x1475   :  { %v2965_v35 = vpack.i.bf16 %v2727_v7, %v1932_v8 }
0x1477   :  { %2966 = vrot.lane.b32.xlu1 %v2965_v35, %s3101_s20 }
0x14e9   :  { %v2967_v32 = vpop.permute.xlu1 %2966 }
0x14ea   :  { %v2969_v17 = vunpack.i.h.bf16 %v2967_v32  ;;  %v2968_v18 = vunpack.i.l.bf16 %v2967_v32 }
0x14ec   :  { %v1970_v21 = vsel %vm1138_vm4, %v1968_v20, %v2969_v17  ;;  %v1969_v22 = vsel %vm1138_vm4, %v1967_v19, %v2968_v18  ;;  %v2980_v18 = vld [vmem:[%s3649_s8] sm:$0xff]   ;;  %v2981_v19 = vld [vmem:[%s3649_s8 + $0x8] sm:$0xff]  }
0x14ed   :  { %v1972_v23 = vpack.c.bf16 %v1970_v21, %v1969_v22  ;;  %2736 = vmatprep.subr.bf16.mxu0 %v2980_v18 }
0x14ee   :  { %2737 = vmatpush3.bf16.msra.mxu0 %v2980_v18 }
0x14ef   :  { %2733 = vmatmul.mubr.msk.bf16.vlgmr.msra.gmra.mrb[16].mxu1 %vm90_vm0, %v1972_v23  ;;  %2738 = vmatprep.subr.bf16.mxu0 %v2981_v19 }
0x14f2   :  { %2739 = vmatpush3.bf16.msra.mxu0 %v2981_v19 }
0x15c2   :  { %v2734_v27 = vpop.f32.mrb[16].mxu1 }
0x15c3   :  { %v2036_v41 = vpop.f32.mrb[17].mxu1  ;;  %v2045_v34 = vadd.f32 %v2734_v27, %v2503_v24 }
0x15c4   :  { %v2037_v25 = vadd.f32 %v2503_v24, %v2036_v41  ;;  %v2735_v36 = vpop.f32.mrb[18].mxu1 }
0x15c5   :  { %v2039_v26 = vpop.f32.mrb[19].mxu1  ;;  %v2048_v42 = vadd.f32 %v2735_v36, %v2503_v24  ;;  %v3086_v36 = vld [vmem:[%s3645_s3] sm:$0x3] }
0x15c6   :  { %v2040_v33 = vadd.f32 %v2503_v24, %v2039_v26  ;;  %2055 = vrot.lane.b32.xlu0 %v2037_v25, %s3089_s5  ;;  %v67_v26 = vrot.slane %v3086_v36, %v3224_v49 }
0x15c8   :  { %2057 = vrot.lane.b32.xlu1 %v2040_v33, %s3089_s5 }
0x15ca   :  { %2059 = vrot.lane.b32.xlu0 %v2045_v34, %s3089_s5 }
0x15cc   :  { %2061 = vrot.lane.b32.xlu1 %v2048_v42, %s3089_s5  ;;  %v131_v42 = vadd.f32 %v3226_v51, %v67_v26 }
0x1638   :  { %v2056_v29 = vpop.permute.xlu0 %2055 }
0x1639   :  { %v2067_v30 = vmul.f32 %v2056_v29, %v3229_v53 }
0x163a   :  { %v2058_v31 = vpop.permute.xlu1 %2057 }
0x163b   :  { %v2068_v38 = vmul.f32 %v2058_v31, %v3229_v53  ;;  %2075 = vrot.lane.b32.xlu0 %v2067_v30, %s3089_s5  ;;  %v3570_v30 = vrot.slane %v131_v42, %v3224_v49 }
0x163c   :  { %v2060_v39 = vpop.permute.xlu0 %2059 }
0x163d   :  { %v2069_v40 = vmul.f32 %v2060_v39, %v3232_v54  ;;  %2077 = vrot.lane.b32.xlu1 %v2068_v38, %s3089_s5  ;;  %v3573_v38 = vrot.slane %v131_v42, %v3215_v44 }
0x163e   :  { %v2062_v45 = vpop.permute.xlu1 %2061 }
0x163f   :  { %v2070_v11 = vmul.f32 %v2062_v45, %v3232_v54  ;;  %2079 = vrot.lane.b32.xlu0 %v2069_v40, %s3089_s5 }
0x1641   :  { %2081 = vrot.lane.b32.xlu1 %v2070_v11, %s3089_s5  ;;  %v2144_v11 = vadd.f32 1.0, %v3570_v30 }
0x16ad   :  { %v2076_v12 = vpop.permute.xlu0 %2075 }
0x16ae   :  { %v3521_v46 = vadd.f32 %v3082_v28, %v2076_v12  ;;  %v2143_v28 = vadd.f32 1.0, %v3573_v38 }
0x16af   :  { %v2078_v47 = vpop.permute.xlu1 %2077 }
0x16b0   :  { %v3526_v50 = vadd.f32 %v3083_v48, %v2078_v47  ;;  %v2091_v52 = vsel %vm90_vm0, %v3521_v46, 0.0 }
0x16b1   :  { %2092 = vadd.xlane.f32.xlu0 %v2091_v52  ;;  %v2080_v57 = vpop.permute.xlu0 %2079 }
0x16b2   :  { %v3533_v58 = vadd.f32 %v3084_v55, %v2080_v57  ;;  %v2094_v56 = vsel %vm90_vm0, %v3526_v50, 0.0 }
0x16b3   :  { %2095 = vadd.xlane.f32.xlu1 %v2094_v56  ;;  %v2082_v62 = vpop.permute.xlu1 %2081 }
0x16b4   :  { %v3540_v63 = vadd.f32 %v3085_v37, %v2082_v62  ;;  %v2097_v0 = vsel %vm90_vm0, %v3533_v58, 0.0 }
0x16b5   :  { %2098 = vadd.xlane.f32.xlu0 %v2097_v0 }
0x16b6   :  { %v2100_v1 = vsel %vm90_vm0, %v3540_v63, 0.0 }
0x16b9   :  { %2101 = vadd.xlane.f32.xlu0 %v2100_v1 }
0x173e   :  { %v2093_v59 = vpop.xlane.xlu0 %2092 }
0x173f   :  { %v2103_v60 = vmul.f32 0.03125, %v2093_v59 }
0x1740   :  { %v2096_v2 = vpop.xlane.xlu1 %2095 }
0x1741   :  { %v2107_v61 = vsub.f32 %v3521_v46, %v2103_v60  ;;  %v2104_v4 = vmul.f32 0.03125, %v2096_v2  ;;  %v2982_v60 = vld [vmem:[%s3650_s10] sm:$0xff]   ;;  %v2984_v2 = vld [vmem:[%s3650_s10 + $0x10] sm:$0xff]  }
0x1742   :  { %v2099_v9 = vpop.xlane.xlu0 %2098  ;;  %2744 = vmatprep.subr.bf16.mxu1 %v2982_v60 }
0x1743   :  { %v2105_v3 = vmul.f32 0.03125, %v2099_v9  ;;  %v2111_v10 = vmul.f32 %v2107_v61, %v2107_v61  ;;  %v2108_v8 = vsub.f32 %v3526_v50, %v2104_v4  ;;  %2745 = vmatpush3.bf16.msra.mxu1 %v2982_v60  ;;  %v2985_v9 = vld [vmem:[%s3650_s10 + $0x18] sm:$0xff]   ;;  %v2988_v4 = vld [vmem:[%s3650_s10 + $0x30] sm:$0xff]  }
0x1745   :  { %v2109_v5 = vsub.f32 %v3533_v58, %v2105_v3  ;;  %v2115_v6 = vsel %vm90_vm0, %v2111_v10, 0.0  ;;  %v2112_v32 = vmul.f32 %v2108_v8, %v2108_v8  ;;  %v2986_v3 = vld [vmem:[%s3650_s10 + $0x20] sm:$0xff]   ;;  %v2987_v10 = vld [vmem:[%s3650_s10 + $0x28] sm:$0xff]  }
0x1746   :  { %2116 = vadd.xlane.f32.xlu0 %v2115_v6  ;;  %v2102_v15 = vpop.xlane.xlu0 %2101  ;;  %v2508_v6 = vld [vmem:[%s3651_s9] ss:$0 sm:$0xff] }
0x1747   :  { %v2106_v16 = vmul.f32 0.03125, %v2102_v15  ;;  %v2113_v7 = vmul.f32 %v2109_v5, %v2109_v5  ;;  %v2118_v17 = vsel %vm90_vm0, %v2112_v32, 0.0 }
0x1749   :  { %v2110_v35 = vsub.f32 %v3540_v63, %v2106_v16  ;;  %v2121_v13 = vsel %vm90_vm0, %v2113_v7, 0.0 }
0x174a   :  { %2122 = vadd.xlane.f32.xlu0 %v2121_v13 }
0x174b   :  { %v2114_v43 = vmul.f32 %v2110_v35, %v2110_v35 }
0x174d   :  { %v2124_v14 = vsel %vm90_vm0, %v2114_v43, 0.0 }
0x174e   :  { %2125 = vadd.xlane.f32.xlu1 %v2124_v14 }
0x1752   :  { %2119 = vadd.xlane.f32.xlu1 %v2118_v17 }
0x1760   :  { %2149 = vrot.lane.b32.xlu0 %v3229_v53, %s3102_s0 }
0x1763   :  { %2151 = vrot.lane.b32.xlu1 %v3232_v54, %s3102_s0 }
0x17d3   :  { %v2117_v20 = vpop.xlane.xlu0 %2116 }
0x17d4   :  { %v2127_v21 = vmul.f32 0.03125, %v2117_v20 }
0x17d6   :  { %v2131_v53 = vadd.f32 1e-06, %v2127_v21 }
0x17d7   :  { %v2123_v22 = vpop.xlane.xlu0 %2122 }
0x17d8   :  { %v2129_v23 = vmul.f32 0.03125, %v2123_v22  ;;  %3066 = vrsqrt.f32 %v2131_v53 }
0x17da   :  { %v2133_v24 = vadd.f32 1e-06, %v2129_v23 }
0x17db   :  { %v2126_v27 = vpop.xlane.xlu1 %2125  ;;  %v2150_v56 = vpop.permute.xlu0 %2149 }
0x17dc   :  { %v2130_v54 = vmul.f32 0.03125, %v2126_v27  ;;  %3068 = vrsqrt.f32 %v2133_v24 }
0x17de   :  { %v2134_v41 = vadd.f32 1e-06, %v2130_v54 }
0x17df   :  { %v2120_v25 = vpop.xlane.xlu1 %2119 }
0x17e0   :  { %3070 = vrsqrt.f32 %v2134_v41  ;;  %v2128_v33 = vmul.f32 0.03125, %v2120_v25 }
0x17e2   :  { %v2132_v34 = vadd.f32 1e-06, %v2128_v33  ;;  %v3067_v29 = vpop.eup %3066 }
0x17e3   :  { %v2139_v40 = vmul.f32 %v3067_v29, %v2107_v61  ;;  %v2152_v55 = vpop.permute.xlu1 %2151  ;;  %v2983_v61 = vld [vmem:[%s3650_s10 + $0x8] sm:$0xff]  }
0x17e4   :  { %3072 = vrsqrt.f32 %v2132_v34  ;;  %2746 = vmatprep.subr.bf16.mxu1 %v2983_v61 }
0x17e5   :  { %v2145_v51 = vmul.f32 %v2143_v28, %v2139_v40  ;;  %2747 = vmatpush3.bf16.msra.mxu1 %v2983_v61 }
0x17e6   :  { %v3069_v31 = vpop.eup %3068  ;;  %2748 = vmatprep.subr.bf16.mxu1 %v2984_v2 }
0x17e7   :  { %v2141_v12 = vmul.f32 %v3069_v31, %v2109_v5  ;;  %v2155_v37 = vadd.f32 %v2150_v56, %v2145_v51  ;;  %v2989_v5 = vld [vmem:[%s3650_s10 + $0x38] sm:$0xff]  }
0x17e9   :  { %v2147_v57 = vmul.f32 %v2144_v11, %v2141_v12  ;;  %2749 = vmatpush3.bf16.msra.mxu1 %v2984_v2 }
0x17ea   :  { %v3071_v39 = vpop.eup %3070  ;;  %2750 = vmatprep.subr.bf16.mxu1 %v2985_v9 }
0x17eb   :  { %v2142_v45 = vmul.f32 %v3071_v39, %v2110_v35  ;;  %v2157_v0 = vadd.f32 %v2152_v55, %v2147_v57 }
0x17ed   :  { %v2148_v48 = vmul.f32 %v2144_v11, %v2142_v45  ;;  %2751 = vmatpush3.bf16.msra.mxu1 %v2985_v9 }
0x17ee   :  { %v3073_v47 = vpop.eup %3072  ;;  %2752 = vmatprep.subr.bf16.mxu1 %v2986_v3 }
0x17ef   :  { %v2140_v52 = vmul.f32 %v3073_v47, %v2108_v8  ;;  %v2158_v62 = vadd.f32 %v2152_v55, %v2148_v48 }
0x17f1   :  { %v2146_v49 = vmul.f32 %v2143_v28, %v2140_v52  ;;  %v2160_v59 = vpack.c.bf16 %v2158_v62, %v2157_v0  ;;  %2753 = vmatpush3.bf16.msra.mxu1 %v2986_v3  ;;  %v2513_v0 = vld [vmem:[%s3652_s11] ss:$0 sm:$0xff] }
0x17f2   :  { %2754 = vmatprep.subr.bf16.mxu1 %v2987_v10 }
0x17f3   :  { %v2156_v44 = vadd.f32 %v2150_v56, %v2146_v49 }
0x17f5   :  { %v2159_v1 = vpack.c.bf16 %v2156_v44, %v2155_v37  ;;  %2755 = vmatpush3.bf16.msra.mxu1 %v2987_v10 }
0x17f6   :  { %2756 = vmatprep.subr.bf16.mxu1 %v2988_v4 }
0x17f7   :  { %2740 = vmatprep.mubr.msk.bf16.mxu0 %vm90_vm0, %v2159_v1 }
0x17f8   :  { %2741 = vmatmul.mubr.msk.bf16.vlgmr.msra.gmra.mrb[28].mxu0 %vm90_vm0, %v2160_v59 }
0x17f9   :  { %2757 = vmatpush3.bf16.msra.mxu1 %v2988_v4 }
0x17fa   :  { %2758 = vmatprep.subr.bf16.mxu1 %v2989_v5 }
0x17fd   :  { %2759 = vmatpush3.bf16.msra.mxu1 %v2989_v5 }
0x18cb   :  { %v2742_v15 = vpop.f32.mrb[28].mxu0 }
0x18cc   :  { %v2233_v16 = vadd.f32 %v2742_v15, %v2508_v6  ;;  %v2224_v7 = vpop.f32.mrb[29].mxu0 }
0x18cd   :  { %v2225_v8 = vadd.f32 %v2508_v6, %v2224_v7  ;;  %v2743_v35 = vpop.f32.mrb[30].mxu0 }
0x18ce   :  { %v2245_v13 = vmul.f32 0.044715, %v2233_v16  ;;  %v2236_v43 = vadd.f32 %v2743_v35, %v2508_v6  ;;  %v2227_v14 = vpop.f32.mrb[31].mxu0  ;;  %v2241_v28 = vmul.f32 0.5, %v2233_v16 }
0x18cf   :  { %v2243_v32 = vmul.f32 0.044715, %v2225_v8  ;;  %v2228_v17 = vadd.f32 %v2508_v6, %v2227_v14  ;;  %v2239_v51 = vmul.f32 0.5, %v2225_v8 }
0x18d0   :  { %v2249_v18 = vmul.f32 %v2245_v13, %v2233_v16  ;;  %v2246_v19 = vmul.f32 0.044715, %v2236_v43  ;;  %v2242_v47 = vmul.f32 0.5, %v2236_v43 }
0x18d1   :  { %v2247_v20 = vmul.f32 %v2243_v32, %v2225_v8  ;;  %v2244_v21 = vmul.f32 0.044715, %v2228_v17  ;;  %v2240_v52 = vmul.f32 0.5, %v2228_v17 }
0x18d2   :  { %v2253_v22 = vmul.f32 %v2249_v18, %v2233_v16  ;;  %v2250_v23 = vmul.f32 %v2246_v19, %v2236_v43 }
0x18d3   :  { %v2251_v53 = vmul.f32 %v2247_v20, %v2225_v8  ;;  %v2248_v24 = vmul.f32 %v2244_v21, %v2228_v17 }
0x18d4   :  { %v2257_v27 = vadd.f32 %v2253_v22, %v2233_v16  ;;  %v2254_v54 = vmul.f32 %v2250_v23, %v2236_v43 }
0x18d5   :  { %v2252_v41 = vmul.f32 %v2248_v24, %v2228_v17  ;;  %v2255_v25 = vadd.f32 %v2251_v53, %v2225_v8 }
0x18d6   :  { %v2261_v36 = vmul.f32 0.7978846, %v2257_v27  ;;  %v2258_v26 = vadd.f32 %v2254_v54, %v2236_v43 }
0x18d7   :  { %v2256_v33 = vadd.f32 %v2252_v41, %v2228_v17  ;;  %v2259_v34 = vmul.f32 0.7978846, %v2255_v25 }
0x18d8   :  { %3074 = vtanh.f32 %v2261_v36  ;;  %v2262_v42 = vmul.f32 0.7978846, %v2258_v26 }
0x18d9   :  { %v2260_v29 = vmul.f32 0.7978846, %v2256_v33  ;;  %3076 = vtanh.f32 %v2259_v34 }
0x18da   :  { %3078 = vtanh.f32 %v2262_v42 }
0x18db   :  { %3080 = vtanh.f32 %v2260_v29 }
0x18e2   :  { %v3075_v31 = vpop.eup %3074 }
0x18e3   :  { %v3077_v39 = vpop.eup %3076  ;;  %v2269_v40 = vadd.f32 1.0, %v3075_v31 }
0x18e4   :  { %v3079_v45 = vpop.eup %3078  ;;  %v2267_v11 = vadd.f32 1.0, %v3077_v39 }
0x18e5   :  { %v3081_v12 = vpop.eup %3080  ;;  %v2270_v48 = vadd.f32 1.0, %v3079_v45  ;;  %v2273_v55 = vmul.f32 %v2269_v40, %v2241_v28 }
0x18e6   :  { %v2268_v57 = vadd.f32 1.0, %v3081_v12  ;;  %v2271_v56 = vmul.f32 %v2267_v11, %v2239_v51 }
0x18e7   :  { %v2274_v49 = vmul.f32 %v2270_v48, %v2242_v47 }
0x18e8   :  { %v2272_v62 = vmul.f32 %v2268_v57, %v2240_v52 }
0x18e9   :  { %v2276_v37 = vpack.c.bf16 %v2274_v49, %v2273_v55 }
0x18ea   :  { %v2275_v44 = vpack.c.bf16 %v2272_v62, %v2271_v56 }
0x18ec   :  { %2760 = vmatprep.mubr.bf16.mxu1 %v2275_v44 }
0x18ed   :  { %2761 = vmatmul.mubr.bf16.vlgmr.msra.gmra.mrb[20].mxu1 %v2276_v37 }
0x19c0   :  { %v2762_v1 = vpop.f32.mrb[20].mxu1 }
0x19c1   :  { %v2391_v59 = vadd.f32 %v2762_v1, %v2513_v0  ;;  %v2382_v60 = vpop.f32.mrb[21].mxu1 }
0x19c2   :  { %v2383_v61 = vadd.f32 %v2513_v0, %v2382_v60  ;;  %v2763_v2 = vpop.f32.mrb[22].mxu1 }
0x19c3   :  { %2405 = vrot.lane.b32.xlu0 %v2391_v59, %s3102_s0  ;;  %v2385_v9 = vpop.f32.mrb[23].mxu1  ;;  %v2394_v10 = vadd.f32 %v2763_v2, %v2513_v0 }
0x19c4   :  { %2401 = vrot.lane.b32.xlu1 %v2383_v61, %s3102_s0  ;;  %v2386_v3 = vadd.f32 %v2513_v0, %v2385_v9 }
0x19c8   :  { %2403 = vrot.lane.b32.xlu1 %v2386_v3, %s3102_s0 }
0x19cc   :  { %2407 = vrot.lane.b32.xlu1 %v2394_v10, %s3102_s0 }
0x1a35   :  { %v2406_v6 = vpop.permute.xlu0 %2405 }
0x1a36   :  { %v2402_v4 = vpop.permute.xlu1 %2401  ;;  %v2415_v16 = vmul.f32 %v2406_v6, %v3570_v30 }
0x1a37   :  { %v2413_v5 = vmul.f32 %v2402_v4, %v3573_v38 }
0x1a39   :  { %2421 = vrot.lane.b32.xlu0 %v2413_v5, %s3088_s4 }
0x1a3a   :  { %v2404_v15 = vpop.permute.xlu1 %2403 }
0x1a3b   :  { %v2414_v7 = vmul.f32 %v2404_v15, %v3573_v38 }
0x1a3d   :  { %2425 = vrot.lane.b32.xlu0 %v2415_v16, %s3088_s4  ;;  %2423 = vrot.lane.b32.xlu1 %v2414_v7, %s3088_s4 }
0x1a3e   :  { %v2408_v8 = vpop.permute.xlu1 %2407 }
0x1a3f   :  { %v2416_v35 = vmul.f32 %v2408_v8, %v3570_v30 }
0x1a41   :  { %2427 = vrot.lane.b32.xlu1 %v2416_v35, %s3088_s4 }
0x1aab   :  { %v2422_v13 = vpop.permute.xlu0 %2421 }
0x1aac   :  { %v2433_v43 = vadd.f32 %v2422_v13, %v3521_v46 }
0x1aae   :  { %2437 = vst.msk [vmem:[%s3653_s12] sm:$0xff] %vm90_vm0, %v2433_v43 }
0x1aaf   :  { %v2426_v14 = vpop.permute.xlu0 %2425  ;;  %v2424_v32 = vpop.permute.xlu1 %2423 }
0x1ab0   :  { %v2435_v38 = vadd.f32 %v2426_v14, %v3533_v58  ;;  %v2434_v17 = vadd.f32 %v2424_v32, %v3526_v50 }
0x1ab2   :  { %2439 = vst.msk [vmem:[%s3653_s12 + $0x10] sm:$0xff] %vm90_vm0, %v2435_v38  ;;  %2438 = vst.msk [vmem:[%s3653_s12 + $0x8] sm:$0xff] %vm90_vm0, %v2434_v17 }
0x1ab3   :  { %v2428_v46 = vpop.permute.xlu1 %2427 }
0x1ab4   :  { %v2436_v30 = vadd.f32 %v2428_v46, %v3540_v63 }
0x1ab6   :  { %2440 = vst.msk [vmem:[%s3653_s12 + $0x18] sm:$0xff] %vm90_vm0, %v2436_v30 }

</bundles_post_ra>
